<compile_context>
chip_gen: v7x
topology: tpu7x:2x2x1
jax: 0.10.0
libtpu: 0.0.40
codegen_flags: <defaults>
</compile_context>

<pallas_src>
import functools

import numpy as np
import jax
import jax.numpy as jnp
from jax import lax
from jax.experimental import pallas as pl
from jax.experimental.pallas import tpu as pltpu

F32 = jnp.float32
BF16 = jnp.bfloat16
_INV_SQRT2 = float(1.0 / np.sqrt(2.0))
_VMEM_LIMIT = 48 * 1024 * 1024          # fits v7x's 64 MiB physical VMEM


def _round_up(x, m):
    return (x + m - 1) // m * m


def _pad2d(a, rows, cols):
    r, c = a.shape
    if r == rows and c == cols:
        return a
    return jnp.pad(a, ((0, rows - r), (0, cols - c)))


# ---------------------------------------------------------------------------
# Tile planning: (padded dim, tile) chosen once per (K, N); weights are padded
# to this plan at init time so no weight copies happen at call time.
# ---------------------------------------------------------------------------
def _plan_dim(d, cap):
    dp = _round_up(d, 128)
    if dp <= cap:
        return dp, dp                       # single tile
    for t in range(cap, 127, -128):         # largest tile with <=12.5% zero pad
        p = _round_up(d, t)
        if (p - d) * 8 <= d:
            return p, t
    return _round_up(d, 128), 128


@functools.lru_cache(maxsize=None)
def _plan(K, N):
    Kp, tk = _plan_dim(K, 1024)
    Np, tn = _plan_dim(N, 1280)
    return Kp, Np, tk, tn


def _plan_m(M):
    Mp = _round_up(M, 8)
    if Mp > 256:
        Mp = _round_up(M, 256)
    tm = min(Mp, 256)
    return Mp, tm


# ---------------------------------------------------------------------------
# Matmul kernel (bf16 operands, f32 accumulator, fused bias + optional SiLU).
# Used for every Linear, every 1x1 conv and (via im2col) every 3x3 conv.
# ---------------------------------------------------------------------------
def _matmul_kernel(x_ref, w_ref, b_ref, o_ref, acc_ref, *, activation):
    @pl.when(pl.program_id(2) == 0)
    def _():
        acc_ref[...] = jnp.zeros_like(acc_ref)

    acc_ref[...] += jnp.dot(x_ref[...].astype(BF16), w_ref[...],
                            preferred_element_type=jnp.float32)

    @pl.when(pl.program_id(2) == pl.num_programs(2) - 1)
    def _():
        y = acc_ref[...] + b_ref[...]
        if activation == "silu":
            y = y * pl.reciprocal(1.0 + jnp.exp(-y), approx=True)
        o_ref[...] = y.astype(o_ref.dtype)


@functools.lru_cache(maxsize=None)
def _matmul_call(Mp, Kp, Np, tm, tk, tn, activation):
    grid = (Mp // tm, Np // tn, Kp // tk)
    return pl.pallas_call(
        functools.partial(_matmul_kernel, activation=activation),
        out_shape=jax.ShapeDtypeStruct((Mp, Np), F32),
        grid_spec=pltpu.PrefetchScalarGridSpec(
            num_scalar_prefetch=0,
            grid=grid,
            in_specs=[
                pl.BlockSpec((tm, tk), lambda i, j, k: (i, k)),
                pl.BlockSpec((tk, tn), lambda i, j, k: (k, j)),
                pl.BlockSpec((1, tn), lambda i, j, k: (0, j)),
            ],
            out_specs=pl.BlockSpec((tm, tn), lambda i, j, k: (i, j)),
            scratch_shapes=[pltpu.VMEM((tm, tn), jnp.float32)],
        ),
        compiler_params=pltpu.CompilerParams(
            dimension_semantics=("parallel", "parallel", "arbitrary"),
            vmem_limit_bytes=_VMEM_LIMIT),
    )


def pallas_linear(x, p, activation=None):
    """y = x @ W + b (W pre-padded bf16). x:(M,K) f32/bf16 -> (M, N) f32."""
    M, K = x.shape
    N = p["N"]
    Kp, Np, tk, tn = _plan(K, N)
    Mp, tm = _plan_m(M)
    xp = _pad2d(x, Mp, Kp)
    out = _matmul_call(Mp, Kp, Np, tm, tk, tn, activation)(xp, p["w"], p["b"])
    if Mp == M and Np == N:
        return out
    return out[:M, :N]


# ---------------------------------------------------------------------------
# Fused GEGLU matmul: y = (x@Wa + ba) * gelu(x@Wg + bg), dual f32 accumulators.
# ---------------------------------------------------------------------------
def _erf_f32(x):
    # Abramowitz & Stegun 7.1.26 polynomial, |abs err| <= 1.5e-7.
    a1, a2, a3, a4, a5 = 0.254829592, -0.284496736, 1.421413741, -1.453152027, 1.061405429
    pp = 0.3275911
    sgn = jnp.where(x >= 0.0, 1.0, -1.0)
    ax = jnp.abs(x)
    t = 1.0 / (1.0 + pp * ax)
    poly = ((((a5 * t + a4) * t + a3) * t + a2) * t + a1) * t
    return sgn * (1.0 - poly * jnp.exp(-ax * ax))


def _geglu_matmul_kernel(x_ref, wa_ref, wg_ref, ba_ref, bg_ref, o_ref,
                         acc_a, acc_g):
    @pl.when(pl.program_id(2) == 0)
    def _():
        acc_a[...] = jnp.zeros_like(acc_a)
        acc_g[...] = jnp.zeros_like(acc_g)

    xb = x_ref[...].astype(BF16)
    acc_a[...] += jnp.dot(xb, wa_ref[...], preferred_element_type=jnp.float32)
    acc_g[...] += jnp.dot(xb, wg_ref[...], preferred_element_type=jnp.float32)

    @pl.when(pl.program_id(2) == pl.num_programs(2) - 1)
    def _():
        a = acc_a[...] + ba_ref[...]
        g = acc_g[...] + bg_ref[...]
        gelu_g = 0.5 * g * (1.0 + _erf_f32(g * _INV_SQRT2))
        o_ref[...] = (a * gelu_g).astype(o_ref.dtype)


@functools.lru_cache(maxsize=None)
def _geglu_call(Mp, Kp, Np, tm, tk, tn):
    grid = (Mp // tm, Np // tn, Kp // tk)
    return pl.pallas_call(
        _geglu_matmul_kernel,
        out_shape=jax.ShapeDtypeStruct((Mp, Np), F32),
        grid_spec=pltpu.PrefetchScalarGridSpec(
            num_scalar_prefetch=0,
            grid=grid,
            in_specs=[
                pl.BlockSpec((tm, tk), lambda i, j, k: (i, k)),
                pl.BlockSpec((tk, tn), lambda i, j, k: (k, j)),
                pl.BlockSpec((tk, tn), lambda i, j, k: (k, j)),
                pl.BlockSpec((1, tn), lambda i, j, k: (0, j)),
                pl.BlockSpec((1, tn), lambda i, j, k: (0, j)),
            ],
            out_specs=pl.BlockSpec((tm, tn), lambda i, j, k: (i, j)),
            scratch_shapes=[pltpu.VMEM((tm, tn), jnp.float32),
                            pltpu.VMEM((tm, tn), jnp.float32)],
        ),
        compiler_params=pltpu.CompilerParams(
            dimension_semantics=("parallel", "parallel", "arbitrary"),
            vmem_limit_bytes=_VMEM_LIMIT),
    )


def pallas_geglu_linear(x, p):
    M, K = x.shape
    N = p["N"]
    Kp, Np, tk, tn = _plan(K, N)
    Mp, tm = _plan_m(M)
    xp = _pad2d(x, Mp, Kp)
    out = _geglu_call(Mp, Kp, Np, tm, tk, tn)(xp, p["wa"], p["wg"],
                                              p["ba"], p["bg"])
    if Mp == M and Np == N:
        return out
    return out[:M, :N]


# ---------------------------------------------------------------------------
# GroupNorm kernel: lane-dense (B, HW, C) layout, per-group stats via a small
# one-hot matmul, affine + optional fused SiLU.  Two-pass variance.
# ---------------------------------------------------------------------------
def _groupnorm_kernel(x_ref, g_ref, b_ref, m_ref, o_ref, *, eps, inv_n,
                      activation):
    x = x_ref[0]                              # (HW, C)
    onehot = m_ref[...]                       # (C, G)

    s1 = jnp.sum(x, axis=0, keepdims=True)                            # (1, C)
    gmean = jnp.dot(s1, onehot, preferred_element_type=jnp.float32) * inv_n
    mean_c = lax.dot_general(gmean, onehot, (((1,), (1,)), ((), ())),
                             preferred_element_type=jnp.float32)      # (1, C)
    d = x - mean_c
    s2 = jnp.sum(d * d, axis=0, keepdims=True)                        # (1, C)
    gvar = jnp.dot(s2, onehot, preferred_element_type=jnp.float32) * inv_n
    ginv = lax.rsqrt(gvar + eps)                                      # (1, G)
    inv_c = lax.dot_general(ginv, onehot, (((1,), (1,)), ((), ())),
                            preferred_element_type=jnp.float32)       # (1, C)

    y = d * inv_c * g_ref[...] + b_ref[...]
    if activation == "silu":
        y = y * pl.reciprocal(1.0 + jnp.exp(-y), approx=True)
    o_ref[0] = y


@functools.lru_cache(maxsize=None)
def _groupnorm_call(B, HW, C, G, eps, activation):
    cg = C // G
    inv_n = 1.0 / float(HW * cg)
    return pl.pallas_call(
        functools.partial(_groupnorm_kernel, eps=eps, inv_n=inv_n,
                          activation=activation),
        out_shape=jax.ShapeDtypeStruct((B, HW, C), F32),
        grid=(B,),
        in_specs=[
            pl.BlockSpec((1, HW, C), lambda b: (b, 0, 0)),
            pl.BlockSpec((1, C), lambda b: (0, 0)),
            pl.BlockSpec((1, C), lambda b: (0, 0)),
            pl.BlockSpec((C, G), lambda b: (0, 0)),
        ],
        out_specs=pl.BlockSpec((1, HW, C), lambda b: (b, 0, 0)),
        compiler_params=pltpu.CompilerParams(
            dimension_semantics=("parallel",),
            vmem_limit_bytes=_VMEM_LIMIT),
    )


@functools.lru_cache(maxsize=None)
def _group_onehot(C, G):
    cg = C // G
    m = np.zeros((C, G), np.float32)
    m[np.arange(C), np.arange(C) // cg] = 1.0
    return jnp.asarray(m)


def pallas_groupnorm(x, gamma, beta, *, eps, activation=None, groups=32):
    """x: (B, HW, C) channels-last.  Matches torch.nn.GroupNorm(groups, C)."""
    B, HW, C = x.shape
    onehot = _group_onehot(C, groups)
    return _groupnorm_call(B, HW, C, groups, float(eps), activation)(
        x, gamma.reshape(1, C), beta.reshape(1, C), onehot)


# ---------------------------------------------------------------------------
# LayerNorm kernel (normalize over last dim, two-pass variance)
# ---------------------------------------------------------------------------
def _layernorm_kernel(x_ref, g_ref, b_ref, o_ref, *, eps):
    x = x_ref[0]                              # (S, C)
    m = jnp.mean(x, axis=-1, keepdims=True)
    d = x - m
    v = jnp.mean(d * d, axis=-1, keepdims=True)
    o_ref[0] = d * lax.rsqrt(v + eps) * g_ref[...] + b_ref[...]


@functools.lru_cache(maxsize=None)
def _layernorm_call(B, S, C, eps):
    return pl.pallas_call(
        functools.partial(_layernorm_kernel, eps=eps),
        out_shape=jax.ShapeDtypeStruct((B, S, C), F32),
        grid=(B,),
        in_specs=[
            pl.BlockSpec((1, S, C), lambda b: (b, 0, 0)),
            pl.BlockSpec((1, C), lambda b: (0, 0)),
            pl.BlockSpec((1, C), lambda b: (0, 0)),
        ],
        out_specs=pl.BlockSpec((1, S, C), lambda b: (b, 0, 0)),
        compiler_params=pltpu.CompilerParams(
            dimension_semantics=("parallel",),
            vmem_limit_bytes=_VMEM_LIMIT),
    )


def pallas_layernorm(x, gamma, beta, eps=1e-5):
    B, S, C = x.shape
    return _layernorm_call(B, S, C, float(eps))(
        x, gamma.reshape(1, C), beta.reshape(1, C))


# ---------------------------------------------------------------------------
# Attention kernel: all heads of one image per grid step (batched einsum),
# scaled dot-product + softmax + weighted sum.
# ---------------------------------------------------------------------------
def _attention_kernel(q_ref, k_ref, v_ref, o_ref, *, scale):
    q = q_ref[0]                              # (H, Sq, D)
    k = k_ref[0]                              # (H, Sk, D)
    v = v_ref[0]                              # (H, Sk, D)
    s = jnp.einsum('hqd,hkd->hqk', q, k,
                   preferred_element_type=jnp.float32) * scale
    s = s - jnp.max(s, axis=-1, keepdims=True)
    p = jnp.exp(s)
    p = p * pl.reciprocal(jnp.sum(p, axis=-1, keepdims=True), approx=True)
    o_ref[0] = jnp.einsum('hqk,hkd->hqd', p, v,
                          preferred_element_type=jnp.float32)


@functools.lru_cache(maxsize=None)
def _attention_call(B, H, Sq, Sk, D, scale):
    return pl.pallas_call(
        functools.partial(_attention_kernel, scale=scale),
        out_shape=jax.ShapeDtypeStruct((B, H, Sq, D), F32),
        grid=(B,),
        in_specs=[
            pl.BlockSpec((1, H, Sq, D), lambda b: (b, 0, 0, 0)),
            pl.BlockSpec((1, H, Sk, D), lambda b: (b, 0, 0, 0)),
            pl.BlockSpec((1, H, Sk, D), lambda b: (b, 0, 0, 0)),
        ],
        out_specs=pl.BlockSpec((1, H, Sq, D), lambda b: (b, 0, 0, 0)),
        compiler_params=pltpu.CompilerParams(
            dimension_semantics=("parallel",),
            vmem_limit_bytes=_VMEM_LIMIT),
    )


def pallas_attention(q, k, v):
    """q: (B, H, Sq, D), k/v: (B, H, Sk, D) -> (B, H, Sq, D)."""
    B, H, Sq, D = q.shape
    Sk = k.shape[2]
    scale = float(1.0 / np.sqrt(D))
    return _attention_call(B, H, Sq, Sk, D, scale)(q, k, v)


# ---------------------------------------------------------------------------
# Standalone SiLU (only used once per forward, on silu(time_embedding))
# ---------------------------------------------------------------------------
def _silu_kernel(x_ref, o_ref):
    x = x_ref[...]
    o_ref[...] = x * pl.reciprocal(1.0 + jnp.exp(-x), approx=True)


@functools.lru_cache(maxsize=None)
def _silu_call(M, N):
    return pl.pallas_call(
        _silu_kernel,
        out_shape=jax.ShapeDtypeStruct((M, N), F32),
        grid=(1,),
        in_specs=[pl.BlockSpec((M, N), lambda i: (0, 0))],
        out_specs=pl.BlockSpec((M, N), lambda i: (0, 0)),
    )


def pallas_silu(x):
    M, N = x.shape
    return _silu_call(M, N)(x)


# ---------------------------------------------------------------------------
# Conv wrappers (im2col glue in bf16 + Pallas matmul)
# ---------------------------------------------------------------------------
def conv2d_3x3(p, x, stride=1):
    """x: (B, H, W, Cin); weight pre-packed as (9*Cin, Cout), (kh, kw, cin) order."""
    B, H, W, C = x.shape
    xb = x.astype(BF16)                              # bf16 patches: half the traffic
    xp = jnp.pad(xb, ((0, 0), (1, 1), (1, 1), (0, 0)))
    Ho = (H + 2 - 3) // stride + 1
    Wo = (W + 2 - 3) // stride + 1
    cols = []
    for kh in range(3):
        for kw in range(3):
            cols.append(xp[:, kh:kh + stride * (Ho - 1) + 1:stride,
                            kw:kw + stride * (Wo - 1) + 1:stride, :])
    patches = jnp.concatenate(cols, axis=-1).reshape(B * Ho * Wo, 9 * C)
    y = pallas_linear(patches, p)
    return y.reshape(B, Ho, Wo, -1)


def conv2d_1x1(p, x):
    B, H, W, C = x.shape
    y = pallas_linear(x.reshape(B * H * W, C), p)
    return y.reshape(B, H, W, -1)


# ---------------------------------------------------------------------------
# Attention sub-modules (SelfAttention / CrossAttention semantics)
# ---------------------------------------------------------------------------
def _split_heads(t, B, S, n_heads):
    C = t.shape[-1]
    dh = C // n_heads
    return t.reshape(B, S, n_heads, dh).transpose(0, 2, 1, 3)   # (B, H, S, D)


def _merge_heads(t, B, S, n_heads):
    dh = t.shape[-1]
    return t.transpose(0, 2, 1, 3).reshape(B * S, n_heads * dh)


def self_attention(p, x, n_heads):
    B, S, C = x.shape
    qkv = pallas_linear(x.reshape(B * S, C), p["in_proj"])      # no in_proj bias
    qkv = qkv.reshape(B, S, 3 * C)
    q = _split_heads(qkv[..., :C], B, S, n_heads)
    k = _split_heads(qkv[..., C:2 * C], B, S, n_heads)
    v = _split_heads(qkv[..., 2 * C:], B, S, n_heads)
    o = pallas_attention(q, k, v)
    o = _merge_heads(o, B, S, n_heads)
    o = pallas_linear(o, p["out"])
    return o.reshape(B, S, C)


def cross_attention(p, x, ctx, n_heads):
    B, S, C = x.shape
    Bc, Sc, Dc = ctx.shape
    q = pallas_linear(x.reshape(B * S, C), p["q"]).reshape(B, S, C)
    k = pallas_linear(ctx.reshape(Bc * Sc, Dc), p["k"]).reshape(Bc, Sc, C)
    v = pallas_linear(ctx.reshape(Bc * Sc, Dc), p["v"]).reshape(Bc, Sc, C)
    o = pallas_attention(_split_heads(q, B, S, n_heads),
                         _split_heads(k, Bc, Sc, n_heads),
                         _split_heads(v, Bc, Sc, n_heads))
    o = _merge_heads(o, B, S, n_heads)
    o = pallas_linear(o, p["out"])
    return o.reshape(B, S, C)


# ---------------------------------------------------------------------------
# UNET blocks
# ---------------------------------------------------------------------------
def residual_block(p, feature, t_silu):
    B, H, W, Cin = feature.shape
    residue = feature
    h = pallas_groupnorm(feature.reshape(B, H * W, Cin),
                         p["gn_f"]["g"], p["gn_f"]["b"],
                         eps=1e-5, activation="silu").reshape(B, H, W, Cin)
    h = conv2d_3x3(p["conv_f"], h)
    t = pallas_linear(t_silu, p["lin_t"])          # silu(time) precomputed once
    merged = h + t[:, None, None, :]
    Cout = merged.shape[-1]
    merged = pallas_groupnorm(merged.reshape(B, H * W, Cout),
                              p["gn_m"]["g"], p["gn_m"]["b"],
                              eps=1e-5, activation="silu").reshape(B, H, W, Cout)
    merged = conv2d_3x3(p["conv_m"], merged)
    if "res" in p:
        residue = conv2d_1x1(p["res"], residue)
    return merged + residue


def attention_block(p, x, context):
    n_heads = p["n_heads"]
    B, H, W, C = x.shape
    residue_long = x
    h = pallas_groupnorm(x.reshape(B, H * W, C), p["gn"]["g"], p["gn"]["b"],
                         eps=1e-6)
    h = conv2d_1x1(p["conv_in"], h.reshape(B, H, W, C)).reshape(B, H * W, C)

    resid = h
    hn = pallas_layernorm(h, p["ln1"]["g"], p["ln1"]["b"])
    h = self_attention(p["attn1"], hn, n_heads) + resid

    resid = h
    hn = pallas_layernorm(h, p["ln2"]["g"], p["ln2"]["b"])
    h = cross_attention(p["attn2"], hn, context, n_heads) + resid

    resid = h
    hn = pallas_layernorm(h, p["ln3"]["g"], p["ln3"]["b"])
    y = pallas_geglu_linear(hn.reshape(B * H * W, C), p["geglu1"])  # a*gelu(g) fused
    y = pallas_linear(y, p["geglu2"])
    h = y.reshape(B, H * W, C) + resid

    out = conv2d_1x1(p["conv_out"], h.reshape(B, H, W, C))
    return out + residue_long


def upsample_block(p, x):
    x = jnp.repeat(jnp.repeat(x, 2, axis=1), 2, axis=2)   # nearest, scale_factor=2
    return conv2d_3x3(p["conv"], x)


def apply_layer(layer, x, context, t_silu):
    kind, p = layer
    if kind == "res":
        return residual_block(p, x, t_silu)
    if kind == "attn":
        return attention_block(p, x, context)
    if kind == "conv":
        return conv2d_3x3(p["p"], x, stride=p["stride"])
    if kind == "up":
        return upsample_block(p, x)
    raise ValueError(kind)


def apply_sequential(layers, x, context, t_silu):
    for layer in layers:
        x = apply_layer(layer, x, context, t_silu)
    return x


def unet_forward(p, x, context, t_silu):
    skips = []
    for layers in p["encoders"]:
        x = apply_sequential(layers, x, context, t_silu)
        skips.append(x)
    x = apply_sequential(p["bottleneck"], x, context, t_silu)
    for layers in p["decoders"]:
        x = jnp.concatenate([x, skips.pop()], axis=-1)    # channel concat (torch dim=1)
        x = apply_sequential(layers, x, context, t_silu)
    return x


def diffusion_forward(params, latent_nchw, context, time):
    # TimeEmbedding: Linear(320,1280) + SiLU (fused) + Linear(1280,1280)
    t = pallas_linear(time, params["time"]["l1"], activation="silu")
    t = pallas_linear(t, params["time"]["l2"])
    # silu(time) used by every residual block: compute once, reuse everywhere.
    t_silu = pallas_silu(t)

    x = jnp.transpose(latent_nchw, (0, 2, 3, 1))          # NCHW -> NHWC
    x = unet_forward(params["unet"], x, context, t_silu)

    # UNET_OutputLayer: GroupNorm(32,320) + SiLU (fused) + Conv3x3(320 -> 4)
    B, H, W, C = x.shape
    x = pallas_groupnorm(x.reshape(B, H * W, C),
                         params["final"]["gn"]["g"], params["final"]["gn"]["b"],
                         eps=1e-5, activation="silu").reshape(B, H, W, C)
    x = conv2d_3x3(params["final"]["conv"], x)
    return jnp.transpose(x, (0, 3, 1, 2))                 # NHWC -> NCHW


# ---------------------------------------------------------------------------
# Deterministic parameter initialization (synthetic weights, not a checkpoint).
# All matmul weights are packed to their tile plan and stored as bf16 here.
# ---------------------------------------------------------------------------
class KeyGen:
    def __init__(self, key):
        self._key = key
        self._n = 0

    def __call__(self):
        self._n += 1
        return jax.random.fold_in(self._key, self._n)


def _pack_linear(w, b, K, N):
    Kp, Np, _, _ = _plan(K, N)
    wp = jnp.pad(w, ((0, Kp - K), (0, Np - N))).astype(BF16)
    bb = b if b is not None else jnp.zeros((N,), F32)
    bp = jnp.pad(bb, (0, Np - N)).reshape(1, Np).astype(F32)
    return {"w": wp, "b": bp, "K": K, "N": N}


def _pack_geglu(w, b, C):
    # w: (C, 8C), b: (8C,) ; split into value (a) and gate (g) halves.
    N = 4 * C
    Kp, Np, _, _ = _plan(C, N)
    wa = jnp.pad(w[:, :N], ((0, Kp - C), (0, Np - N))).astype(BF16)
    wg = jnp.pad(w[:, N:], ((0, Kp - C), (0, Np - N))).astype(BF16)
    ba = jnp.pad(b[:N], (0, Np - N)).reshape(1, Np).astype(F32)
    bg = jnp.pad(b[N:], (0, Np - N)).reshape(1, Np).astype(F32)
    return {"wa": wa, "wg": wg, "ba": ba, "bg": bg, "K": C, "N": N}


def init_linear(rng, fan_in, fan_out, bias=True):
    w = jax.random.normal(rng(), (fan_in, fan_out), F32) / np.sqrt(fan_in)
    b = 0.02 * jax.random.normal(rng(), (fan_out,), F32) if bias else None
    return _pack_linear(w, b, fan_in, fan_out)


def init_conv3(rng, cin, cout):
    # torch weight (cout, cin, 3, 3) stored pre-reshaped as (9*cin, cout), (kh,kw,cin) order
    w = jax.random.normal(rng(), (9 * cin, cout), F32) / np.sqrt(9 * cin)
    b = 0.02 * jax.random.normal(rng(), (cout,), F32)
    return _pack_linear(w, b, 9 * cin, cout)


def init_conv1(rng, cin, cout):
    w = jax.random.normal(rng(), (cin, cout), F32) / np.sqrt(cin)
    b = 0.02 * jax.random.normal(rng(), (cout,), F32)
    return _pack_linear(w, b, cin, cout)


def init_norm(rng, c):
    return {"g": 1.0 + 0.02 * jax.random.normal(rng(), (c,), F32),
            "b": 0.02 * jax.random.normal(rng(), (c,), F32)}


def init_geglu1(rng, C):
    w = jax.random.normal(rng(), (C, 8 * C), F32) / np.sqrt(C)
    b = 0.02 * jax.random.normal(rng(), (8 * C,), F32)
    return _pack_geglu(w, b, C)


def build_residual(rng, cin, cout):
    p = {"gn_f": init_norm(rng, cin),
         "conv_f": init_conv3(rng, cin, cout),
         "lin_t": init_linear(rng, 1280, cout),
         "gn_m": init_norm(rng, cout),
         "conv_m": init_conv3(rng, cout, cout)}
    if cin != cout:
        p["res"] = init_conv1(rng, cin, cout)
    return ("res", p)


def build_attention(rng, n_heads, n_embed, d_context=768):
    C = n_heads * n_embed
    p = {
        "n_heads": n_heads,
        "gn": init_norm(rng, C),
        "conv_in": init_conv1(rng, C, C),
        "ln1": init_norm(rng, C),
        "attn1": {"in_proj": init_linear(rng, C, 3 * C, bias=False),
                  "out": init_linear(rng, C, C)},
        "ln2": init_norm(rng, C),
        "attn2": {"q": init_linear(rng, C, C, bias=False),
                  "k": init_linear(rng, d_context, C, bias=False),
                  "v": init_linear(rng, d_context, C, bias=False),
                  "out": init_linear(rng, C, C)},
        "ln3": init_norm(rng, C),
        "geglu1": init_geglu1(rng, C),
        "geglu2": init_linear(rng, 4 * C, C),
        "conv_out": init_conv1(rng, C, C),
    }
    return ("attn", p)


def build_conv(rng, cin, cout, stride):
    return ("conv", {"p": init_conv3(rng, cin, cout), "stride": stride})


def build_upsample(rng, c):
    return ("up", {"conv": init_conv3(rng, c, c)})


def build_diffusion_params(key):
    rng = KeyGen(key)
    params = {"time": {"l1": init_linear(rng, 320, 1280),
                       "l2": init_linear(rng, 1280, 1280)}}
    encoders = [
        [build_conv(rng, 4, 320, 1)],
        [build_residual(rng, 320, 320), build_attention(rng, 8, 40)],
        [build_residual(rng, 320, 320), build_attention(rng, 8, 40)],
        [build_conv(rng, 320, 320, 2)],
        [build_residual(rng, 320, 640), build_attention(rng, 8, 80)],
        [build_residual(rng, 640, 640), build_attention(rng, 8, 80)],
        [build_conv(rng, 640, 640, 2)],
        [build_residual(rng, 640, 1280), build_attention(rng, 8, 160)],
        [build_residual(rng, 1280, 1280), build_attention(rng, 8, 160)],
        [build_conv(rng, 1280, 1280, 2)],
        [build_residual(rng, 1280, 1280)],
        [build_residual(rng, 1280, 1280)],
    ]
    bottleneck = [build_residual(rng, 1280, 1280),
                  build_attention(rng, 8, 160),
                  build_residual(rng, 1280, 1280)]
    decoders = [
        [build_residual(rng, 2560, 1280)],
        [build_residual(rng, 2560, 1280)],
        [build_residual(rng, 2560, 1280), build_upsample(rng, 1280)],
        [build_residual(rng, 2560, 1280), build_attention(rng, 8, 160)],
        [build_residual(rng, 2560, 1280), build_attention(rng, 8, 160)],
        [build_residual(rng, 1920, 1280), build_attention(rng, 8, 160), build_upsample(rng, 1280)],
        [build_residual(rng, 1920, 640), build_attention(rng, 8, 80)],
        [build_residual(rng, 1280, 640), build_attention(rng, 8, 80)],
        [build_residual(rng, 960, 640), build_attention(rng, 8, 80), build_upsample(rng, 640)],
        [build_residual(rng, 960, 320), build_attention(rng, 8, 40)],
        [build_residual(rng, 640, 320), build_attention(rng, 8, 40)],
        [build_residual(rng, 640, 320), build_attention(rng, 8, 40)],
    ]
    params["unet"] = {"encoders": encoders, "bottleneck": bottleneck, "decoders": decoders}
    params["final"] = {"gn": init_norm(rng, 320), "conv": init_conv3(rng, 320, 4)}
    return params


if __name__ == "__main__":
    params = build_diffusion_params(jax.random.PRNGKey(0))

    k1, k2, k3 = jax.random.split(jax.random.PRNGKey(0), 3)
    latent = jax.random.normal(k1, (2, 4, 16, 16), F32)    # (B, 4, H, W), NCHW
    context = jax.random.normal(k2, (2, 8, 768), F32)      # (B, seq, 768)
    time = jax.random.normal(k3, (1, 320), F32)            # (1, 320)

    out = diffusion_forward(params, latent, context, time)
    out = jax.block_until_ready(out)

    assert out.shape == (2, 4, 16, 16), out.shape
    assert bool(jnp.all(jnp.isfinite(out)))
    print("KERNEL_OK")
</pallas_src>

<mosaic_0001>
module attributes {stable_mosaic.version = 11 : i64} {
  func.func @_matmul_kernel(%arg0: i32, %arg1: i32, %arg2: i32, %arg3: memref<8x384xf32, #tpu.memory_space<vmem>>, %arg4: memref<384x1280xbf16, #tpu.memory_space<vmem>>, %arg5: memref<1x1280xf32, #tpu.memory_space<vmem>>, %arg6: memref<8x1280xf32, #tpu.memory_space<vmem>>, %arg7: memref<8x1280xf32, #tpu.memory_space<vmem>>) attributes {dimension_semantics = [#tpu.dimension_semantics<parallel>, #tpu.dimension_semantics<parallel>, #tpu.dimension_semantics<arbitrary>], iteration_bounds = array<i64: 1, 1, 1>, scalar_prefetch = 0 : i64, scratch_operands = 1 : i64, tpu.core_type = #tpu.core_type<tc>, window_params = [{transform_indices = @transform_0, window_bounds = array<i64: 8, 384>}, {transform_indices = @transform_1, window_bounds = array<i64: 384, 1280>}, {transform_indices = @transform_2, window_bounds = array<i64: 1, 1280>}, {transform_indices = @transform_3, window_bounds = array<i64: 8, 1280>}]} {
    %c0_i32 = arith.constant 0 : i32
    %0 = arith.cmpi eq, %arg2, %c0_i32 : i32
    %1 = arith.extui %0 : i1 to i32
    %c0_i32_0 = arith.constant 0 : i32
    %2 = arith.cmpi ne, %1, %c0_i32_0 : i32
    scf.if %2 {
      %cst_10 = arith.constant 0.000000e+00 : f32
      %13 = vector.broadcast %cst_10 : f32 to vector<8x1280xf32>
      %c0_11 = arith.constant 0 : index
      %c0_12 = arith.constant 0 : index
      %14 = vector.load %arg7[%c0_11, %c0_12] : memref<8x1280xf32, #tpu.memory_space<vmem>>, vector<8x1280xf32>
      tpu.vector_store %arg7[%c0_11, %c0_12], %13 {strides = array<i32>} : memref<8x1280xf32, #tpu.memory_space<vmem>>, vector<8x1280xf32>,
    } else {
    }
    %c0 = arith.constant 0 : index
    %c0_1 = arith.constant 0 : index
    %3 = vector.load %arg7[%c0, %c0_1] : memref<8x1280xf32, #tpu.memory_space<vmem>>, vector<8x1280xf32>
    %c0_2 = arith.constant 0 : index
    %c0_3 = arith.constant 0 : index
    %4 = vector.load %arg3[%c0_2, %c0_3] : memref<8x384xf32, #tpu.memory_space<vmem>>, vector<8x384xf32>
    %5 = arith.truncf %4 : vector<8x384xf32> to vector<8x384xbf16>
    %c0_4 = arith.constant 0 : index
    %c0_5 = arith.constant 0 : index
    %6 = vector.load %arg4[%c0_4, %c0_5] : memref<384x1280xbf16, #tpu.memory_space<vmem>>, vector<384x1280xbf16>
    %cst = arith.constant dense<0.000000e+00> : vector<8x1280xf32>
    %7 = tpu.matmul %5, %6, %cst {dimension_numbers = #tpu.dot_dimension_numbers<[1], [0], [0], [1], [0, 0, 1, 1], [], []>} : vector<8x384xbf16>, vector<384x1280xbf16>, vector<8x1280xf32> -> vector<8x1280xf32>
    %8 = arith.addf %3, %7 : vector<8x1280xf32>
    %c0_6 = arith.constant 0 : index
    %c0_7 = arith.constant 0 : index
    %9 = vector.load %arg7[%c0_6, %c0_7] : memref<8x1280xf32, #tpu.memory_space<vmem>>, vector<8x1280xf32>
    tpu.vector_store %arg7[%c0_6, %c0_7], %8 {strides = array<i32>} : memref<8x1280xf32, #tpu.memory_space<vmem>>, vector<8x1280xf32>,
    %c0_i32_8 = arith.constant 0 : i32
    %10 = arith.cmpi eq, %arg2, %c0_i32_8 : i32
    %11 = arith.extui %10 : i1 to i32
    %c0_i32_9 = arith.constant 0 : i32
    %12 = arith.cmpi ne, %11, %c0_i32_9 : i32
    scf.if %12 {
      %c0_10 = arith.constant 0 : index
      %c0_11 = arith.constant 0 : index
      %13 = vector.load %arg7[%c0_10, %c0_11] : memref<8x1280xf32, #tpu.memory_space<vmem>>, vector<8x1280xf32>
      %c0_12 = arith.constant 0 : index
      %c0_13 = arith.constant 0 : index
      %14 = vector.load %arg5[%c0_12, %c0_13] : memref<1x1280xf32, #tpu.memory_space<vmem>>, vector<1x1280xf32>
      %15 = vector.broadcast %14 : vector<1x1280xf32> to vector<8x1280xf32>
      %16 = arith.addf %13, %15 : vector<8x1280xf32>
      %cst_14 = arith.constant 0.000000e+00 : f32
      %17 = vector.broadcast %cst_14 : f32 to vector<8x1280xf32>
      %18 = arith.subf %17, %16 : vector<8x1280xf32>
      %19 = math.exp %18 : vector<8x1280xf32>
      %cst_15 = arith.constant 1.000000e+00 : f32
      %20 = vector.broadcast %cst_15 : f32 to vector<8x1280xf32>
      %21 = arith.addf %20, %19 : vector<8x1280xf32>
      %22 = tpu.reciprocal %21 {approx = true} : vector<8x1280xf32> -> vector<8x1280xf32>
      %23 = arith.mulf %16, %22 : vector<8x1280xf32>
      %c0_16 = arith.constant 0 : index
      %c0_17 = arith.constant 0 : index
      %24 = vector.load %arg6[%c0_16, %c0_17] : memref<8x1280xf32, #tpu.memory_space<vmem>>, vector<8x1280xf32>
      tpu.vector_store %arg6[%c0_16, %c0_17], %23 {strides = array<i32>} : memref<8x1280xf32, #tpu.memory_space<vmem>>, vector<8x1280xf32>,
    } else {
    }
    return
  }
  func.func @transform_0(%arg0: i32, %arg1: i32, %arg2: i32) -> (i32, i32) {
    %c0_i32 = arith.constant 0 : i32
    return %arg0, %arg2 : i32, i32
  }
  func.func @transform_1(%arg0: i32, %arg1: i32, %arg2: i32) -> (i32, i32) {
    %c0_i32 = arith.constant 0 : i32
    return %arg2, %arg1 : i32, i32
  }
  func.func @transform_2(%arg0: i32, %arg1: i32, %arg2: i32) -> (i32, i32) {
    %c0_i32 = arith.constant 0 : i32
    %c0_i32_0 = arith.constant 0 : i32
    return %c0_i32, %arg1 : i32, i32
  }
  func.func @transform_3(%arg0: i32, %arg1: i32, %arg2: i32) -> (i32, i32) {
    %c0_i32 = arith.constant 0 : i32
    return %arg0, %arg1 : i32, i32
  }
}

</mosaic_0001>

<bundles_post_ra>
// kernel: tpu_custom_call.1
= control target key start
LH: loop header
LB: loop body
LE: loop exit
PB: predicated region body
PF: predicated region fallthrough
CT: control target
= control target key end

     0   :  { %8 = vsyncpa [#allocation4], 0  ;;  %s2986_s0 = inlined_call_operand.hbm [shape: f32[8,384], index: 0, kind: input, shape index: {}]   ;;  %s2987_s1 = inlined_call_operand.hbm [shape: bf16[384,1280], index: 1, kind: input, shape index: {}]   ;;  %s2988_s2 = inlined_call_operand.hbm [shape: f32[1,1280], index: 2, kind: input, shape index: {}]   ;;  %s2989_s3 = inlined_call_operand.hbm [shape: f32[8,1280], index: 3, kind: output, shape index: {}]  }
   0x1   :  { %9 = vsyncpa [#allocation7], 0 }
   0x2   :  { %10 = vsyncpa [#allocation5], 0  ;;  %s2857_s12 = smov [#allocation6]   ;;  %s2763_s16 = scalar_lea.hbm %s2987_s1, 30720 }
   0x3   :  { %s26_s13 = sshll.u32 %s2857_s12, 4  ;;  %p2764_p0 = scmp.ne.s32.totalorder %s2987_s1, %s2763_s16  ;;  %s27_s13 = int_to_ptr.vmem [resolvable:$true] %s26_s13 }
   0x4   :  { %p2767_p1 = scmp.lt.u32.totalorder %s2763_s16, %s2987_s1 }
   0x6   :  { %p2769_p2 = pnand %p2767_p1, %p2764_p0 }
   0x8   :  { %2772 = shalt.err (!%p2769_p2)
}
   0x9   :  { %s2773_s21 = scalar_lea.vmem %s27_s13, 30720  ;;  %p2778_p4 = scmp.lt.s32.totalorder %s27_s13, %s27_s13 }
   0xa   :  { %p2774_p3 = scmp.ne.s32.totalorder %s27_s13, %s2773_s21  ;;  %p2779_p5 = scmp.lt.s32.totalorder %s2773_s21, %s2773_s21 }
   0xc   :  { %p2780_p6 = por %p2779_p5, %p2778_p4 }
   0xe   :  { %p2781_p7 = pnand %p2780_p6, %p2774_p3 }
  0x10   :  { %2784 = shalt.err (!%p2781_p7)
}
  0x11   :  { %s2858_s22 = smov 640   ;;  %s2859_s23 = smov 40  }
  0x12   :  { %32 = dma.hbm_to_vmem [thread:$0]  %s2987_s1, 30720, %s27_s13, [#allocation7], %s2858_s22, %s2858_s22, %s2859_s23  }
  0x13   :  { %s2860_s26 = smov [#allocation3]   ;;  %s2861_s28 = smov [#allocation8]  }
  0x14   :  { %s17_s27 = sshll.u32 %s2860_s26, 4  ;;  %s39_s29 = sshll.u32 %s2861_s28, 4  ;;  %s18_s27 = int_to_ptr.vmem [resolvable:$true] %s17_s27  ;;  %s40_s29 = int_to_ptr.vmem [resolvable:$true] %s39_s29 }
  0x15   :  { %s2785_s5 = scalar_lea.hbm %s2986_s0, 384 }
  0x16   :  { %p2786_p8 = scmp.ne.s32.totalorder %s2986_s0, %s2785_s5  ;;  %p2789_p9 = scmp.lt.u32.totalorder %s2785_s5, %s2986_s0 }
  0x18   :  { %p2791_p10 = pnand %p2789_p9, %p2786_p8 }
  0x1a   :  { %2794 = shalt.err (!%p2791_p10)
}
  0x1b   :  { %s2795_s1 = scalar_lea.vmem %s18_s27, 384  ;;  %p2800_p12 = scmp.lt.s32.totalorder %s18_s27, %s18_s27 }
  0x1c   :  { %p2796_p11 = scmp.ne.s32.totalorder %s18_s27, %s2795_s1  ;;  %p2801_p13 = scmp.lt.s32.totalorder %s2795_s1, %s2795_s1 }
  0x1e   :  { %p2802_p0 = por %p2801_p13, %p2800_p12 }
  0x20   :  { %p2803_p1 = pnand %p2802_p0, %p2796_p11 }
  0x22   :  { %2806 = shalt.err (!%p2803_p1)
}
  0x23   :  { %20 = dma.hbm_to_vmem [thread:$0]  %s2986_s0, 384, %s18_s27, [#allocation4]  }
  0x24   :  { %s2807_s14 = scalar_lea.hbm %s2988_s2, 160 }
  0x25   :  { %p2808_p2 = scmp.ne.s32.totalorder %s2988_s2, %s2807_s14  ;;  %p2811_p3 = scmp.lt.u32.totalorder %s2807_s14, %s2988_s2 }
  0x27   :  { %p2813_p4 = pnand %p2811_p3, %p2808_p2 }
  0x29   :  { %2816 = shalt.err (!%p2813_p4)
}
  0x2a   :  { %s2817_s19 = scalar_lea.vmem %s40_s29, 160  ;;  %p2822_p6 = scmp.lt.s32.totalorder %s40_s29, %s40_s29 }
  0x2b   :  { %p2818_p5 = scmp.ne.s32.totalorder %s40_s29, %s2817_s19  ;;  %p2823_p7 = scmp.lt.s32.totalorder %s2817_s19, %s2817_s19 }
  0x2d   :  { %p2824_p8 = por %p2823_p7, %p2822_p6 }
  0x2f   :  { %p2825_p9 = pnand %p2824_p8, %p2818_p5 }
  0x31   :  { %2828 = shalt.err (!%p2825_p9)
}
  0x32   :  { %42 = dma.hbm_to_vmem [thread:$0]  %s2988_s2, 160, %s40_s29, [#allocation7]  }
  0x33   :  { %2851 = dma.done.wait [#allocation4], 384  }
  0x34   :  { %2852 = vsyncadd [#allocation4], 4294966912 }
  0x35   :  { %2853 = dma.done.wait [#allocation7], 30880  }
  0x36   :  { %2854 = vsyncadd [#allocation7], 4294936416  ;;  %v2862_v0 = vmov 0   ;;  %v2363_v1 = vld [vmem:[#allocation6 + $0x4] ss:$40 sps:$4 sm:$0xff]   ;;  %v79_v33 = vld [vmem:[#allocation3 + $0x10] sm:$0xff] }
  0x37   :  { %1596 = vmatprep.mubr.bf16.mxu1 %v2862_v0  ;;  %v2365_v2 = vld [vmem:[#allocation6 + $0x504] ss:$40 sps:$4 sm:$0xff]   ;;  %1523 = vmatprep.subr.bf16.mxu0 %v2363_v1  ;;  %v2367_v3 = vld [vmem:[#allocation6] ss:$40 sps:$4 sm:$0xff]   ;;  %v2369_v5 = vld [vmem:[#allocation6 + $0x54] ss:$40 sps:$4 sm:$0xff]   ;;  %v2921_v38 = vpack.c.bf16 %v79_v33, %v79_v33 }
  0x38   :  { %v2368_v4 = vld [vmem:[#allocation6 + $0x500] ss:$40 sps:$4 sm:$0xff]   ;;  %1564 = vmatprep.subr.bf16.mxu1 %v2365_v2  ;;  %1524 = vmatpush1.bf16.msra.mxu0 %v2367_v3  ;;  %v2371_v6 = vld [vmem:[#allocation6 + $0x554] ss:$40 sps:$4 sm:$0xff]   ;;  %v2373_v7 = vld [vmem:[#allocation6 + $0x50] ss:$40 sps:$4 sm:$0xff]  }
  0x39   :  { %1565 = vmatpush1.bf16.msra.mxu1 %v2368_v4  ;;  %1525 = vmatprep.subr.bf16.mxu0 %v2369_v5  ;;  %v2374_v8 = vld [vmem:[#allocation6 + $0x550] ss:$40 sps:$4 sm:$0xff]   ;;  %v2375_v9 = vld [vmem:[#allocation6 + $0xa4] ss:$40 sps:$4 sm:$0xff]   ;;  %v2379_v11 = vld [vmem:[#allocation6 + $0xa0] ss:$40 sps:$4 sm:$0xff]  }
  0x3a   :  { %1566 = vmatprep.subr.bf16.mxu1 %v2371_v6  ;;  %v2377_v10 = vld [vmem:[#allocation6 + $0x5a4] ss:$40 sps:$4 sm:$0xff]   ;;  %v2380_v12 = vld [vmem:[#allocation6 + $0x5a0] ss:$40 sps:$4 sm:$0xff]   ;;  %v2381_v13 = vld [vmem:[#allocation6 + $0xf4] ss:$40 sps:$4 sm:$0xff]  }
  0x3b   :  { %v2383_v14 = vld [vmem:[#allocation6 + $0x5f4] ss:$40 sps:$4 sm:$0xff]   ;;  %v2385_v15 = vld [vmem:[#allocation6 + $0xf0] ss:$40 sps:$4 sm:$0xff]   ;;  %v2387_v17 = vld [vmem:[#allocation6 + $0x144] ss:$40 sps:$4 sm:$0xff]  }
  0x3c   :  { %1526 = vmatpush1.bf16.msra.mxu0 %v2373_v7  ;;  %v2386_v16 = vld [vmem:[#allocation6 + $0x5f0] ss:$40 sps:$4 sm:$0xff]   ;;  %v2389_v18 = vld [vmem:[#allocation6 + $0x644] ss:$40 sps:$4 sm:$0xff]   ;;  %v2391_v19 = vld [vmem:[#allocation6 + $0x140] ss:$40 sps:$4 sm:$0xff]  }
  0x3d   :  { %1567 = vmatpush1.bf16.msra.mxu1 %v2374_v8  ;;  %1527 = vmatprep.subr.bf16.mxu0 %v2375_v9  ;;  %v2392_v20 = vld [vmem:[#allocation6 + $0x640] ss:$40 sps:$4 sm:$0xff]   ;;  %v2393_v21 = vld [vmem:[#allocation6 + $0x194] ss:$40 sps:$4 sm:$0xff]   ;;  %v2397_v23 = vld [vmem:[#allocation6 + $0x190] ss:$40 sps:$4 sm:$0xff]  }
  0x3e   :  { %1568 = vmatprep.subr.bf16.mxu1 %v2377_v10  ;;  %v2395_v22 = vld [vmem:[#allocation6 + $0x694] ss:$40 sps:$4 sm:$0xff]   ;;  %v2398_v24 = vld [vmem:[#allocation6 + $0x690] ss:$40 sps:$4 sm:$0xff]   ;;  %v2399_v25 = vld [vmem:[#allocation6 + $0x1e4] ss:$40 sps:$4 sm:$0xff]  }
  0x3f   :  { %v2401_v26 = vld [vmem:[#allocation6 + $0x6e4] ss:$40 sps:$4 sm:$0xff]   ;;  %v2403_v27 = vld [vmem:[#allocation6 + $0x1e0] ss:$40 sps:$4 sm:$0xff]   ;;  %v2405_v29 = vld [vmem:[#allocation6 + $0x234] ss:$40 sps:$4 sm:$0xff]  }
  0x40   :  { %1528 = vmatpush1.bf16.msra.mxu0 %v2379_v11  ;;  %v2404_v28 = vld [vmem:[#allocation6 + $0x6e0] ss:$40 sps:$4 sm:$0xff]   ;;  %v2407_v30 = vld [vmem:[#allocation6 + $0x734] ss:$40 sps:$4 sm:$0xff]   ;;  %v2409_v31 = vld [vmem:[#allocation6 + $0x230] ss:$40 sps:$4 sm:$0xff]  }
  0x41   :  { %1569 = vmatpush1.bf16.msra.mxu1 %v2380_v12  ;;  %1529 = vmatprep.subr.bf16.mxu0 %v2381_v13  ;;  %v2410_v32 = vld [vmem:[#allocation6 + $0x730] ss:$40 sps:$4 sm:$0xff]   ;;  %v2411_v34 = vld [vmem:[#allocation6 + $0x284] ss:$40 sps:$4 sm:$0xff]   ;;  %v2416_v37 = vld [vmem:[#allocation6 + $0x280] ss:$40 sps:$4 sm:$0xff]  }
  0x42   :  { %1570 = vmatprep.subr.bf16.mxu1 %v2383_v14  ;;  %v2415_v35 = vld [vmem:[#allocation6 + $0xc] ss:$40 sps:$4 sm:$0xff]   ;;  %v2413_v36 = vld [vmem:[#allocation6 + $0x8] ss:$40 sps:$4 sm:$0xff]   ;;  %v2421_v40 = vld [vmem:[#allocation6 + $0x5c] ss:$40 sps:$4 sm:$0xff]  }
  0x43   :  { %v2417_v39 = vld [vmem:[#allocation6 + $0x2d4] ss:$40 sps:$4 sm:$0xff]   ;;  %v2419_v41 = vld [vmem:[#allocation6 + $0x58] ss:$40 sps:$4 sm:$0xff]   ;;  %v2423_v43 = vld [vmem:[#allocation6 + $0x324] ss:$40 sps:$4 sm:$0xff]  }
  0x44   :  { %1530 = vmatpush1.bf16.msra.mxu0 %v2385_v15  ;;  %v2422_v42 = vld [vmem:[#allocation6 + $0x2d0] ss:$40 sps:$4 sm:$0xff]   ;;  %v2427_v44 = vld [vmem:[#allocation6 + $0xac] ss:$40 sps:$4 sm:$0xff]   ;;  %v2428_v46 = vld [vmem:[#allocation6 + $0x320] ss:$40 sps:$4 sm:$0xff]  }
  0x45   :  { %1571 = vmatpush1.bf16.msra.mxu1 %v2386_v16  ;;  %1531 = vmatprep.subr.bf16.mxu0 %v2387_v17  ;;  %v2425_v45 = vld [vmem:[#allocation6 + $0xa8] ss:$40 sps:$4 sm:$0xff]   ;;  %v2429_v47 = vld [vmem:[#allocation6 + $0x374] ss:$40 sps:$4 sm:$0xff]   ;;  %v2431_v49 = vld [vmem:[#allocation6 + $0xf8] ss:$40 sps:$4 sm:$0xff]  }
  0x46   :  { %1572 = vmatprep.subr.bf16.mxu1 %v2389_v18  ;;  %v2433_v48 = vld [vmem:[#allocation6 + $0xfc] ss:$40 sps:$4 sm:$0xff]   ;;  %v78_v50 = vld [vmem:[#allocation3 + $0x8] sm:$0xff]  ;;  %v2440_v56 = vld [vmem:[#allocation6 + $0x3c0] ss:$40 sps:$4 sm:$0xff]   ;;  %s2863_s2 = smov [#allocation9]  }
  0x47   :  { %v2434_v51 = vld [vmem:[#allocation6 + $0x370] ss:$40 sps:$4 sm:$0xff]   ;;  %v2435_v52 = vld [vmem:[#allocation6 + $0x3c4] ss:$40 sps:$4 sm:$0xff]   ;;  %v2924_v53 = vpack.c.bf16 %v78_v50, %v78_v50  ;;  %v2441_v57 = vld [vmem:[#allocation6 + $0x414] ss:$40 sps:$4 sm:$0xff]  }
  0x48   :  { %1532 = vmatpush1.bf16.msra.mxu0 %v2391_v19  ;;  %v2439_v54 = vld [vmem:[#allocation6 + $0x14c] ss:$40 sps:$4 sm:$0xff]   ;;  %v2437_v55 = vld [vmem:[#allocation6 + $0x148] ss:$40 sps:$4 sm:$0xff]   ;;  %v2445_v58 = vld [vmem:[#allocation6 + $0x19c] ss:$40 sps:$4 sm:$0xff]  }
  0x49   :  { %1573 = vmatpush1.bf16.msra.mxu1 %v2392_v20  ;;  %1533 = vmatprep.subr.bf16.mxu0 %v2393_v21  ;;  %v2443_v59 = vld [vmem:[#allocation6 + $0x198] ss:$40 sps:$4 sm:$0xff]   ;;  %v2447_v61 = vld [vmem:[#allocation6 + $0x464] ss:$40 sps:$4 sm:$0xff]   ;;  %v2449_v63 = vld [vmem:[#allocation6 + $0x1e8] ss:$40 sps:$4 sm:$0xff]  }
  0x4a   :  { %1574 = vmatprep.subr.bf16.mxu1 %v2395_v22  ;;  %1555 = vmatprep.mubr.bf16.mxu0 %v2924_v53  ;;  %v2446_v60 = vld [vmem:[#allocation6 + $0x410] ss:$40 sps:$4 sm:$0xff]   ;;  %v2451_v62 = vld [vmem:[#allocation6 + $0x1ec] ss:$40 sps:$4 sm:$0xff]   ;;  %v2452_v1 = vld [vmem:[#allocation6 + $0x460] ss:$40 sps:$4 sm:$0xff]  }
  0x4b   :  { %v2453_v2 = vld [vmem:[#allocation6 + $0x4b4] ss:$40 sps:$4 sm:$0xff]   ;;  %v2455_v4 = vld [vmem:[#allocation6 + $0x238] ss:$40 sps:$4 sm:$0xff]   ;;  %v77_v6 = vld [vmem:[#allocation3] sm:$0xff]  ;;  %s2106_s21 = sshll.u32 %s2863_s2, 4  ;;  %s2107_s21 = int_to_ptr.vmem [resolvable:$true] %s2106_s21 }
  0x4c   :  { %1534 = vmatpush1.bf16.msra.mxu0 %v2397_v23  ;;  %v2457_v3 = vld [vmem:[#allocation6 + $0x23c] ss:$40 sps:$4 sm:$0xff]   ;;  %v2458_v5 = vld [vmem:[#allocation6 + $0x4b0] ss:$40 sps:$4 sm:$0xff]   ;;  %v2461_v7 = vld [vmem:[#allocation6 + $0x28c] ss:$40 sps:$4 sm:$0xff]   ;;  %v2928_v9 = vpack.c.bf16 %v77_v6, %v77_v6  ;;  %p2834_p11 = scmp.lt.s32.totalorder %s2107_s21, %s2107_s21 }
  0x4d   :  { %1575 = vmatpush1.bf16.msra.mxu1 %v2398_v24  ;;  %1535 = vmatprep.subr.bf16.mxu0 %v2399_v25  ;;  %v2464_v8 = vld [vmem:[#allocation6 + $0x50c] ss:$40 sps:$4 sm:$0xff]   ;;  %v2459_v10 = vld [vmem:[#allocation6 + $0x288] ss:$40 sps:$4 sm:$0xff]   ;;  %v2467_v12 = vld [vmem:[#allocation6 + $0x2dc] ss:$40 sps:$4 sm:$0xff]  }
  0x4e   :  { %1576 = vmatprep.subr.bf16.mxu1 %v2401_v26  ;;  %v2462_v11 = vld [vmem:[#allocation6 + $0x508] ss:$40 sps:$4 sm:$0xff]   ;;  %v2470_v13 = vld [vmem:[#allocation6 + $0x55c] ss:$40 sps:$4 sm:$0xff]   ;;  %v2465_v14 = vld [vmem:[#allocation6 + $0x2d8] ss:$40 sps:$4 sm:$0xff]  }
  0x4f   :  { %v2468_v15 = vld [vmem:[#allocation6 + $0x558] ss:$40 sps:$4 sm:$0xff]   ;;  %v2473_v16 = vld [vmem:[#allocation6 + $0x32c] ss:$40 sps:$4 sm:$0xff]   ;;  %v2471_v18 = vld [vmem:[#allocation6 + $0x328] ss:$40 sps:$4 sm:$0xff]  }
  0x50   :  { %1536 = vmatpush1.bf16.msra.mxu0 %v2403_v27  ;;  %v2476_v17 = vld [vmem:[#allocation6 + $0x5ac] ss:$40 sps:$4 sm:$0xff]   ;;  %v2474_v19 = vld [vmem:[#allocation6 + $0x5a8] ss:$40 sps:$4 sm:$0xff]   ;;  %v2479_v20 = vld [vmem:[#allocation6 + $0x37c] ss:$40 sps:$4 sm:$0xff]  }
  0x51   :  { %1577 = vmatpush1.bf16.msra.mxu1 %v2404_v28  ;;  %1537 = vmatprep.subr.bf16.mxu0 %v2405_v29  ;;  %v2482_v21 = vld [vmem:[#allocation6 + $0x5fc] ss:$40 sps:$4 sm:$0xff]   ;;  %v2477_v22 = vld [vmem:[#allocation6 + $0x378] ss:$40 sps:$4 sm:$0xff]   ;;  %v2485_v24 = vld [vmem:[#allocation6 + $0x3cc] ss:$40 sps:$4 sm:$0xff]  }
  0x52   :  { %1578 = vmatprep.subr.bf16.mxu1 %v2407_v30  ;;  %v2480_v23 = vld [vmem:[#allocation6 + $0x5f8] ss:$40 sps:$4 sm:$0xff]   ;;  %v2488_v25 = vld [vmem:[#allocation6 + $0x64c] ss:$40 sps:$4 sm:$0xff]   ;;  %v2483_v26 = vld [vmem:[#allocation6 + $0x3c8] ss:$40 sps:$4 sm:$0xff]  }
  0x53   :  { %v2486_v27 = vld [vmem:[#allocation6 + $0x648] ss:$40 sps:$4 sm:$0xff]   ;;  %v2491_v28 = vld [vmem:[#allocation6 + $0x41c] ss:$40 sps:$4 sm:$0xff]   ;;  %v2489_v30 = vld [vmem:[#allocation6 + $0x418] ss:$40 sps:$4 sm:$0xff]  }
  0x54   :  { %1538 = vmatpush1.bf16.msra.mxu0 %v2409_v31  ;;  %v2494_v29 = vld [vmem:[#allocation6 + $0x69c] ss:$40 sps:$4 sm:$0xff]   ;;  %v2492_v31 = vld [vmem:[#allocation6 + $0x698] ss:$40 sps:$4 sm:$0xff]   ;;  %v2500_v33 = vld [vmem:[#allocation6 + $0x6ec] ss:$40 sps:$4 sm:$0xff]  }
  0x55   :  { %1579 = vmatpush1.bf16.msra.mxu1 %v2410_v32  ;;  %1539 = vmatprep.subr.bf16.mxu0 %v2411_v34  ;;  %v2497_v32 = vld [vmem:[#allocation6 + $0x46c] ss:$40 sps:$4 sm:$0xff]   ;;  %v2495_v34 = vld [vmem:[#allocation6 + $0x468] ss:$40 sps:$4 sm:$0xff]   ;;  %s2829_s22 = scalar_lea.vmem %s2107_s21, 1280 }
  0x56   :  { %1605 = vmatprep.subr.bf16.mxu1 %v2415_v35  ;;  %v2498_v35 = vld [vmem:[#allocation6 + $0x6e8] ss:$40 sps:$4 sm:$0xff]   ;;  %v2524_v50 = vld [vmem:[#allocation6 + $0x5b4] ss:$40 sps:$4 sm:$0xff]   ;;  %p2830_p10 = scmp.ne.s32.totalorder %s2107_s21, %s2829_s22  ;;  %p2835_p12 = scmp.lt.s32.totalorder %s2829_s22, %s2829_s22 }
  0x57   :  { %v2546_v6 = vld [vmem:[#allocation6 + $0x6f0] ss:$40 sps:$4 sm:$0xff]  }
  0x58   :  { %1597 = vmatmul.mubr.bf16.vlgmr.msra.gmra.mrb[0].mxu1 %v2921_v38  ;;  %1540 = vmatpush1.bf16.msra.mxu0 %v2416_v37  ;;  %v2506_v37 = vld [vmem:[#allocation6 + $0x73c] ss:$40 sps:$4 sm:$0xff]   ;;  %p2836_p13 = por %p2835_p12, %p2834_p11 }
  0x59   :  { %1606 = vmatpush1.bf16.msra.mxu1 %v2413_v36  ;;  %1541 = vmatprep.subr.bf16.mxu0 %v2417_v39  ;;  %v2503_v36 = vld [vmem:[#allocation6 + $0x4bc] ss:$40 sps:$4 sm:$0xff]   ;;  %v2501_v39 = vld [vmem:[#allocation6 + $0x4b8] ss:$40 sps:$4 sm:$0xff]  }
  0x5a   :  { %1607 = vmatprep.subr.bf16.mxu1 %v2421_v40  ;;  %1637 = vmatprep.mubr.bf16.mxu1 %v2924_v53  ;;  %v2504_v40 = vld [vmem:[#allocation6 + $0x738] ss:$40 sps:$4 sm:$0xff]   ;;  %p2837_p0 = pnand %p2836_p13, %p2830_p10 }
  0x5c   :  { %1542 = vmatpush1.bf16.msra.mxu0 %v2422_v42  ;;  %v2512_v42 = vld [vmem:[#allocation6 + $0x514] ss:$40 sps:$4 sm:$0xff]  }
  0x5d   :  { %1608 = vmatpush1.bf16.msra.mxu1 %v2419_v41  ;;  %1543 = vmatprep.subr.bf16.mxu0 %v2423_v43  ;;  %v2509_v41 = vld [vmem:[#allocation6 + $0x14] ss:$40 sps:$4 sm:$0xff]   ;;  %v2507_v43 = vld [vmem:[#allocation6 + $0x10] ss:$40 sps:$4 sm:$0xff]  }
  0x5e   :  { %1609 = vmatprep.subr.bf16.mxu1 %v2427_v44  ;;  %v2510_v44 = vld [vmem:[#allocation6 + $0x510] ss:$40 sps:$4 sm:$0xff]  }
  0x60   :  { %1544 = vmatpush1.bf16.msra.mxu0 %v2428_v46  ;;  %v2518_v46 = vld [vmem:[#allocation6 + $0x564] ss:$40 sps:$4 sm:$0xff]  }
  0x61   :  { %1610 = vmatpush1.bf16.msra.mxu1 %v2425_v45  ;;  %1545 = vmatprep.subr.bf16.mxu0 %v2429_v47  ;;  %v2515_v45 = vld [vmem:[#allocation6 + $0x64] ss:$40 sps:$4 sm:$0xff]   ;;  %v2513_v47 = vld [vmem:[#allocation6 + $0x60] ss:$40 sps:$4 sm:$0xff]  }
  0x62   :  { %1611 = vmatprep.subr.bf16.mxu1 %v2433_v48  ;;  %v2516_v48 = vld [vmem:[#allocation6 + $0x560] ss:$40 sps:$4 sm:$0xff]  }
  0x64   :  { %1546 = vmatpush1.bf16.msra.mxu0 %v2434_v51  ;;  %v2519_v51 = vld [vmem:[#allocation6 + $0xb0] ss:$40 sps:$4 sm:$0xff]  }
  0x65   :  { %1612 = vmatpush1.bf16.msra.mxu1 %v2431_v49  ;;  %1547 = vmatprep.subr.bf16.mxu0 %v2435_v52  ;;  %v2521_v49 = vld [vmem:[#allocation6 + $0xb4] ss:$40 sps:$4 sm:$0xff]   ;;  %v2522_v52 = vld [vmem:[#allocation6 + $0x5b0] ss:$40 sps:$4 sm:$0xff]  }
  0x66   :  { %1613 = vmatprep.subr.bf16.mxu1 %v2439_v54  ;;  %v2527_v54 = vld [vmem:[#allocation6 + $0x104] ss:$40 sps:$4 sm:$0xff]  }
  0x68   :  { %1548 = vmatpush1.bf16.msra.mxu0 %v2440_v56  ;;  %v2525_v56 = vld [vmem:[#allocation6 + $0x100] ss:$40 sps:$4 sm:$0xff]  }
  0x69   :  { %1614 = vmatpush1.bf16.msra.mxu1 %v2437_v55  ;;  %1549 = vmatprep.subr.bf16.mxu0 %v2441_v57  ;;  %v2530_v55 = vld [vmem:[#allocation6 + $0x604] ss:$40 sps:$4 sm:$0xff]   ;;  %v2528_v57 = vld [vmem:[#allocation6 + $0x600] ss:$40 sps:$4 sm:$0xff]  }
  0x6a   :  { %1615 = vmatprep.subr.bf16.mxu1 %v2445_v58  ;;  %v2533_v58 = vld [vmem:[#allocation6 + $0x154] ss:$40 sps:$4 sm:$0xff]  }
  0x6c   :  { %1550 = vmatpush1.bf16.msra.mxu0 %v2446_v60  ;;  %v2531_v60 = vld [vmem:[#allocation6 + $0x150] ss:$40 sps:$4 sm:$0xff]  }
  0x6d   :  { %1616 = vmatpush1.bf16.msra.mxu1 %v2443_v59  ;;  %1551 = vmatprep.subr.bf16.mxu0 %v2447_v61  ;;  %v2536_v59 = vld [vmem:[#allocation6 + $0x654] ss:$40 sps:$4 sm:$0xff]   ;;  %v2534_v61 = vld [vmem:[#allocation6 + $0x650] ss:$40 sps:$4 sm:$0xff]  }
  0x6e   :  { %1617 = vmatprep.subr.bf16.mxu1 %v2451_v62  ;;  %v2539_v62 = vld [vmem:[#allocation6 + $0x1a4] ss:$40 sps:$4 sm:$0xff]  }
  0x70   :  { %1552 = vmatpush1.bf16.msra.mxu0 %v2452_v1  ;;  %v2537_v1 = vld [vmem:[#allocation6 + $0x1a0] ss:$40 sps:$4 sm:$0xff]  }
  0x71   :  { %1618 = vmatpush1.bf16.msra.mxu1 %v2449_v63  ;;  %1553 = vmatprep.subr.bf16.mxu0 %v2453_v2  ;;  %v2542_v63 = vld [vmem:[#allocation6 + $0x6a4] ss:$40 sps:$4 sm:$0xff]   ;;  %v2540_v2 = vld [vmem:[#allocation6 + $0x6a0] ss:$40 sps:$4 sm:$0xff]  }
  0x72   :  { %1619 = vmatprep.subr.bf16.mxu1 %v2457_v3  ;;  %v2545_v3 = vld [vmem:[#allocation6 + $0x1f4] ss:$40 sps:$4 sm:$0xff]  }
  0x74   :  { %1554 = vmatpush1.bf16.msra.mxu0 %v2458_v5  ;;  %v2543_v5 = vld [vmem:[#allocation6 + $0x1f0] ss:$40 sps:$4 sm:$0xff]  }
  0x75   :  { %1620 = vmatpush1.bf16.msra.mxu1 %v2455_v4  ;;  %1646 = vmatprep.subr.bf16.mxu0 %v2464_v8  ;;  %v2548_v4 = vld [vmem:[#allocation6 + $0x6f4] ss:$40 sps:$4 sm:$0xff]   ;;  %v2554_v8 = vld [vmem:[#allocation6 + $0x744] ss:$40 sps:$4 sm:$0xff]  }
  0x76   :  { %1621 = vmatprep.subr.bf16.mxu1 %v2461_v7  ;;  %v2551_v7 = vld [vmem:[#allocation6 + $0x244] ss:$40 sps:$4 sm:$0xff]  }
  0x77   :  { %1556 = vmatmul.mubr.bf16.vlgmr.msra.gmra.mrb[0].mxu0 %v2928_v9 }
  0x78   :  { %1647 = vmatpush1.bf16.msra.mxu0 %v2462_v11  ;;  %1678 = vmatprep.mubr.bf16.mxu0 %v2862_v0  ;;  %v2552_v11 = vld [vmem:[#allocation6 + $0x740] ss:$40 sps:$4 sm:$0xff]  }
  0x79   :  { %1622 = vmatpush1.bf16.msra.mxu1 %v2459_v10  ;;  %1648 = vmatprep.subr.bf16.mxu0 %v2470_v13  ;;  %v2549_v10 = vld [vmem:[#allocation6 + $0x240] ss:$40 sps:$4 sm:$0xff]   ;;  %v2560_v13 = vld [vmem:[#allocation6 + $0x1c] ss:$40 sps:$4 sm:$0xff]  }
  0x7a   :  { %1623 = vmatprep.subr.bf16.mxu1 %v2467_v12  ;;  %v2557_v12 = vld [vmem:[#allocation6 + $0x294] ss:$40 sps:$4 sm:$0xff]  }
  0x7c   :  { %1649 = vmatpush1.bf16.msra.mxu0 %v2468_v15  ;;  %v2558_v15 = vld [vmem:[#allocation6 + $0x18] ss:$40 sps:$4 sm:$0xff]  }
  0x7d   :  { %1624 = vmatpush1.bf16.msra.mxu1 %v2465_v14  ;;  %1650 = vmatprep.subr.bf16.mxu0 %v2476_v17  ;;  %v2555_v14 = vld [vmem:[#allocation6 + $0x290] ss:$40 sps:$4 sm:$0xff]   ;;  %v2566_v17 = vld [vmem:[#allocation6 + $0x6c] ss:$40 sps:$4 sm:$0xff]  }
  0x7e   :  { %1625 = vmatprep.subr.bf16.mxu1 %v2473_v16  ;;  %v2563_v16 = vld [vmem:[#allocation6 + $0x2e4] ss:$40 sps:$4 sm:$0xff]  }
  0x80   :  { %1651 = vmatpush1.bf16.msra.mxu0 %v2474_v19  ;;  %v2564_v19 = vld [vmem:[#allocation6 + $0x68] ss:$40 sps:$4 sm:$0xff]  }
  0x81   :  { %1626 = vmatpush1.bf16.msra.mxu1 %v2471_v18  ;;  %1652 = vmatprep.subr.bf16.mxu0 %v2482_v21  ;;  %v2561_v18 = vld [vmem:[#allocation6 + $0x2e0] ss:$40 sps:$4 sm:$0xff]   ;;  %v2572_v21 = vld [vmem:[#allocation6 + $0xbc] ss:$40 sps:$4 sm:$0xff]  }
  0x82   :  { %1627 = vmatprep.subr.bf16.mxu1 %v2479_v20  ;;  %v2569_v20 = vld [vmem:[#allocation6 + $0x334] ss:$40 sps:$4 sm:$0xff]  }
  0x84   :  { %1653 = vmatpush1.bf16.msra.mxu0 %v2480_v23  ;;  %v2570_v23 = vld [vmem:[#allocation6 + $0xb8] ss:$40 sps:$4 sm:$0xff]  }
  0x85   :  { %1628 = vmatpush1.bf16.msra.mxu1 %v2477_v22  ;;  %1654 = vmatprep.subr.bf16.mxu0 %v2488_v25  ;;  %v2567_v22 = vld [vmem:[#allocation6 + $0x330] ss:$40 sps:$4 sm:$0xff]   ;;  %v2578_v25 = vld [vmem:[#allocation6 + $0x10c] ss:$40 sps:$4 sm:$0xff]  }
  0x86   :  { %1629 = vmatprep.subr.bf16.mxu1 %v2485_v24  ;;  %v2575_v24 = vld [vmem:[#allocation6 + $0x384] ss:$40 sps:$4 sm:$0xff]  }
  0x88   :  { %1655 = vmatpush1.bf16.msra.mxu0 %v2486_v27  ;;  %v2576_v27 = vld [vmem:[#allocation6 + $0x108] ss:$40 sps:$4 sm:$0xff]  }
  0x89   :  { %1630 = vmatpush1.bf16.msra.mxu1 %v2483_v26  ;;  %1656 = vmatprep.subr.bf16.mxu0 %v2494_v29  ;;  %v2573_v26 = vld [vmem:[#allocation6 + $0x380] ss:$40 sps:$4 sm:$0xff]   ;;  %v2584_v29 = vld [vmem:[#allocation6 + $0x15c] ss:$40 sps:$4 sm:$0xff]  }
  0x8a   :  { %1631 = vmatprep.subr.bf16.mxu1 %v2491_v28  ;;  %v2581_v28 = vld [vmem:[#allocation6 + $0x3d4] ss:$40 sps:$4 sm:$0xff]  }
  0x8c   :  { %1657 = vmatpush1.bf16.msra.mxu0 %v2492_v31  ;;  %v2582_v31 = vld [vmem:[#allocation6 + $0x158] ss:$40 sps:$4 sm:$0xff]  }
  0x8d   :  { %1632 = vmatpush1.bf16.msra.mxu1 %v2489_v30  ;;  %1658 = vmatprep.subr.bf16.mxu0 %v2500_v33  ;;  %v2579_v30 = vld [vmem:[#allocation6 + $0x3d0] ss:$40 sps:$4 sm:$0xff]   ;;  %v2590_v33 = vld [vmem:[#allocation6 + $0x1ac] ss:$40 sps:$4 sm:$0xff]  }
  0x8e   :  { %1633 = vmatprep.subr.bf16.mxu1 %v2497_v32  ;;  %v2587_v32 = vld [vmem:[#allocation6 + $0x424] ss:$40 sps:$4 sm:$0xff]  }
  0x90   :  { %1659 = vmatpush1.bf16.msra.mxu0 %v2498_v35  ;;  %v2588_v35 = vld [vmem:[#allocation6 + $0x1a8] ss:$40 sps:$4 sm:$0xff]  }
  0x91   :  { %1634 = vmatpush1.bf16.msra.mxu1 %v2495_v34  ;;  %1660 = vmatprep.subr.bf16.mxu0 %v2506_v37  ;;  %v2585_v34 = vld [vmem:[#allocation6 + $0x420] ss:$40 sps:$4 sm:$0xff]   ;;  %v2596_v37 = vld [vmem:[#allocation6 + $0x1fc] ss:$40 sps:$4 sm:$0xff]  }
  0x92   :  { %1635 = vmatprep.subr.bf16.mxu1 %v2503_v36  ;;  %v2593_v36 = vld [vmem:[#allocation6 + $0x474] ss:$40 sps:$4 sm:$0xff]  }
  0x94   :  { %1661 = vmatpush1.bf16.msra.mxu0 %v2504_v40  ;;  %v2594_v40 = vld [vmem:[#allocation6 + $0x1f8] ss:$40 sps:$4 sm:$0xff]  }
  0x95   :  { %1636 = vmatpush1.bf16.msra.mxu1 %v2501_v39  ;;  %1687 = vmatprep.subr.bf16.mxu0 %v2509_v41  ;;  %v2591_v39 = vld [vmem:[#allocation6 + $0x470] ss:$40 sps:$4 sm:$0xff]   ;;  %v2599_v41 = vld [vmem:[#allocation6 + $0x4c4] ss:$40 sps:$4 sm:$0xff]  }
  0x96   :  { %1728 = vmatprep.subr.bf16.mxu1 %v2512_v42  ;;  %v2602_v42 = vld [vmem:[#allocation6 + $0x24c] ss:$40 sps:$4 sm:$0xff]  }
  0x97   :  { %1679 = vmatmul.mubr.bf16.vlgmr.msra.gmra.mrb[4].mxu0 %v2921_v38 }
  0x98   :  { %1638 = vmatmul.mubr.bf16.vlgmr.msra.gmra.mrb[4].mxu1 %v2928_v9  ;;  %1688 = vmatpush1.bf16.msra.mxu0 %v2507_v43  ;;  %v2597_v43 = vld [vmem:[#allocation6 + $0x4c0] ss:$40 sps:$4 sm:$0xff]  }
  0x99   :  { %1729 = vmatpush1.bf16.msra.mxu1 %v2510_v44  ;;  %1689 = vmatprep.subr.bf16.mxu0 %v2515_v45  ;;  %v2600_v44 = vld [vmem:[#allocation6 + $0x248] ss:$40 sps:$4 sm:$0xff]   ;;  %v2605_v45 = vld [vmem:[#allocation6 + $0x29c] ss:$40 sps:$4 sm:$0xff]  }
  0x9a   :  { %1730 = vmatprep.subr.bf16.mxu1 %v2518_v46  ;;  %1760 = vmatprep.mubr.bf16.mxu1 %v2862_v0  ;;  %v2608_v46 = vld [vmem:[#allocation6 + $0x51c] ss:$40 sps:$4 sm:$0xff]  }
  0x9b   :  { %1719 = vmatprep.mubr.bf16.mxu0 %v2924_v53 }
  0x9c   :  { %1690 = vmatpush1.bf16.msra.mxu0 %v2513_v47  ;;  %v2603_v47 = vld [vmem:[#allocation6 + $0x298] ss:$40 sps:$4 sm:$0xff]  }
  0x9d   :  { %1731 = vmatpush1.bf16.msra.mxu1 %v2516_v48  ;;  %1691 = vmatprep.subr.bf16.mxu0 %v2521_v49  ;;  %v2606_v48 = vld [vmem:[#allocation6 + $0x518] ss:$40 sps:$4 sm:$0xff]   ;;  %v2611_v49 = vld [vmem:[#allocation6 + $0x2ec] ss:$40 sps:$4 sm:$0xff]  }
  0x9e   :  { %1732 = vmatprep.subr.bf16.mxu1 %v2524_v50  ;;  %v2614_v50 = vld [vmem:[#allocation6 + $0x56c] ss:$40 sps:$4 sm:$0xff]  }
  0xa0   :  { %1692 = vmatpush1.bf16.msra.mxu0 %v2519_v51  ;;  %v2609_v51 = vld [vmem:[#allocation6 + $0x2e8] ss:$40 sps:$4 sm:$0xff]  }
  0xa1   :  { %1733 = vmatpush1.bf16.msra.mxu1 %v2522_v52  ;;  %1693 = vmatprep.subr.bf16.mxu0 %v2527_v54  ;;  %v2612_v52 = vld [vmem:[#allocation6 + $0x568] ss:$40 sps:$4 sm:$0xff]   ;;  %v2617_v54 = vld [vmem:[#allocation6 + $0x33c] ss:$40 sps:$4 sm:$0xff]  }
  0xa2   :  { %1734 = vmatprep.subr.bf16.mxu1 %v2530_v55  ;;  %v2620_v55 = vld [vmem:[#allocation6 + $0x5bc] ss:$40 sps:$4 sm:$0xff]  }
  0xa4   :  { %1694 = vmatpush1.bf16.msra.mxu0 %v2525_v56  ;;  %v2615_v56 = vld [vmem:[#allocation6 + $0x338] ss:$40 sps:$4 sm:$0xff]  }
  0xa5   :  { %1735 = vmatpush1.bf16.msra.mxu1 %v2528_v57  ;;  %1695 = vmatprep.subr.bf16.mxu0 %v2533_v58  ;;  %v2618_v57 = vld [vmem:[#allocation6 + $0x5b8] ss:$40 sps:$4 sm:$0xff]   ;;  %v2623_v58 = vld [vmem:[#allocation6 + $0x38c] ss:$40 sps:$4 sm:$0xff]  }
  0xa6   :  { %1736 = vmatprep.subr.bf16.mxu1 %v2536_v59  ;;  %v2626_v59 = vld [vmem:[#allocation6 + $0x60c] ss:$40 sps:$4 sm:$0xff]  }
  0xa8   :  { %1696 = vmatpush1.bf16.msra.mxu0 %v2531_v60  ;;  %v2621_v60 = vld [vmem:[#allocation6 + $0x388] ss:$40 sps:$4 sm:$0xff]  }
  0xa9   :  { %1737 = vmatpush1.bf16.msra.mxu1 %v2534_v61  ;;  %1697 = vmatprep.subr.bf16.mxu0 %v2539_v62  ;;  %v2624_v61 = vld [vmem:[#allocation6 + $0x608] ss:$40 sps:$4 sm:$0xff]   ;;  %v2629_v62 = vld [vmem:[#allocation6 + $0x3dc] ss:$40 sps:$4 sm:$0xff]  }
  0xaa   :  { %1738 = vmatprep.subr.bf16.mxu1 %v2542_v63  ;;  %v2632_v63 = vld [vmem:[#allocation6 + $0x65c] ss:$40 sps:$4 sm:$0xff]  }
  0xac   :  { %1698 = vmatpush1.bf16.msra.mxu0 %v2537_v1  ;;  %v2627_v1 = vld [vmem:[#allocation6 + $0x3d8] ss:$40 sps:$4 sm:$0xff]  }
  0xad   :  { %1739 = vmatpush1.bf16.msra.mxu1 %v2540_v2  ;;  %1699 = vmatprep.subr.bf16.mxu0 %v2545_v3  ;;  %v2630_v2 = vld [vmem:[#allocation6 + $0x658] ss:$40 sps:$4 sm:$0xff]   ;;  %v2635_v3 = vld [vmem:[#allocation6 + $0x42c] ss:$40 sps:$4 sm:$0xff]  }
  0xae   :  { %1740 = vmatprep.subr.bf16.mxu1 %v2548_v4  ;;  %v2638_v4 = vld [vmem:[#allocation6 + $0x6ac] ss:$40 sps:$4 sm:$0xff]  }
  0xb0   :  { %1700 = vmatpush1.bf16.msra.mxu0 %v2543_v5  ;;  %v2633_v5 = vld [vmem:[#allocation6 + $0x428] ss:$40 sps:$4 sm:$0xff]  }
  0xb1   :  { %1741 = vmatpush1.bf16.msra.mxu1 %v2546_v6  ;;  %1701 = vmatprep.subr.bf16.mxu0 %v2551_v7  ;;  %v2636_v6 = vld [vmem:[#allocation6 + $0x6a8] ss:$40 sps:$4 sm:$0xff]   ;;  %v2641_v7 = vld [vmem:[#allocation6 + $0x47c] ss:$40 sps:$4 sm:$0xff]  }
  0xb2   :  { %1742 = vmatprep.subr.bf16.mxu1 %v2554_v8  ;;  %v2644_v8 = vld [vmem:[#allocation6 + $0x6fc] ss:$40 sps:$4 sm:$0xff]  }
  0xb4   :  { %1702 = vmatpush1.bf16.msra.mxu0 %v2549_v10  ;;  %v2639_v10 = vld [vmem:[#allocation6 + $0x478] ss:$40 sps:$4 sm:$0xff]  }
  0xb5   :  { %1743 = vmatpush1.bf16.msra.mxu1 %v2552_v11  ;;  %1703 = vmatprep.subr.bf16.mxu0 %v2557_v12  ;;  %v2642_v11 = vld [vmem:[#allocation6 + $0x6f8] ss:$40 sps:$4 sm:$0xff]   ;;  %v2647_v12 = vld [vmem:[#allocation6 + $0x4cc] ss:$40 sps:$4 sm:$0xff]  }
  0xb6   :  { %1769 = vmatprep.subr.bf16.mxu1 %v2560_v13  ;;  %v2650_v13 = vld [vmem:[#allocation6 + $0x74c] ss:$40 sps:$4 sm:$0xff]  }
  0xb8   :  { %1761 = vmatmul.mubr.bf16.vlgmr.msra.gmra.mrb[8].mxu1 %v2921_v38  ;;  %1704 = vmatpush1.bf16.msra.mxu0 %v2555_v14  ;;  %v2645_v14 = vld [vmem:[#allocation6 + $0x4c8] ss:$40 sps:$4 sm:$0xff]  }
  0xb9   :  { %1770 = vmatpush1.bf16.msra.mxu1 %v2558_v15  ;;  %1705 = vmatprep.subr.bf16.mxu0 %v2563_v16  ;;  %v2648_v15 = vld [vmem:[#allocation6 + $0x748] ss:$40 sps:$4 sm:$0xff]   ;;  %v2653_v16 = vld [vmem:[#allocation6 + $0x24] ss:$40 sps:$4 sm:$0xff]  }
  0xba   :  { %1771 = vmatprep.subr.bf16.mxu1 %v2566_v17  ;;  %1801 = vmatprep.mubr.bf16.mxu1 %v2924_v53  ;;  %v2677_v17 = vld [vmem:[#allocation6 + $0x524] ss:$40 sps:$4 sm:$0xff]  }
  0xbc   :  { %1706 = vmatpush1.bf16.msra.mxu0 %v2561_v18  ;;  %v2651_v18 = vld [vmem:[#allocation6 + $0x20] ss:$40 sps:$4 sm:$0xff]  }
  0xbd   :  { %1772 = vmatpush1.bf16.msra.mxu1 %v2564_v19  ;;  %1707 = vmatprep.subr.bf16.mxu0 %v2569_v20  ;;  %v2675_v19 = vld [vmem:[#allocation6 + $0x520] ss:$40 sps:$4 sm:$0xff]   ;;  %v2656_v20 = vld [vmem:[#allocation6 + $0x74] ss:$40 sps:$4 sm:$0xff]  }
  0xbe   :  { %1773 = vmatprep.subr.bf16.mxu1 %v2572_v21  ;;  %v2683_v21 = vld [vmem:[#allocation6 + $0x574] ss:$40 sps:$4 sm:$0xff]  }
  0xc0   :  { %1708 = vmatpush1.bf16.msra.mxu0 %v2567_v22  ;;  %v2654_v22 = vld [vmem:[#allocation6 + $0x70] ss:$40 sps:$4 sm:$0xff]  }
  0xc1   :  { %1774 = vmatpush1.bf16.msra.mxu1 %v2570_v23  ;;  %1709 = vmatprep.subr.bf16.mxu0 %v2575_v24  ;;  %v2681_v23 = vld [vmem:[#allocation6 + $0x570] ss:$40 sps:$4 sm:$0xff]   ;;  %v2659_v24 = vld [vmem:[#allocation6 + $0xc4] ss:$40 sps:$4 sm:$0xff]  }
  0xc2   :  { %1775 = vmatprep.subr.bf16.mxu1 %v2578_v25  ;;  %v2689_v25 = vld [vmem:[#allocation6 + $0x5c4] ss:$40 sps:$4 sm:$0xff]  }
  0xc4   :  { %1710 = vmatpush1.bf16.msra.mxu0 %v2573_v26  ;;  %v2657_v26 = vld [vmem:[#allocation6 + $0xc0] ss:$40 sps:$4 sm:$0xff]  }
  0xc5   :  { %1776 = vmatpush1.bf16.msra.mxu1 %v2576_v27  ;;  %1711 = vmatprep.subr.bf16.mxu0 %v2581_v28  ;;  %v2687_v27 = vld [vmem:[#allocation6 + $0x5c0] ss:$40 sps:$4 sm:$0xff]   ;;  %v2662_v28 = vld [vmem:[#allocation6 + $0x114] ss:$40 sps:$4 sm:$0xff]  }
  0xc6   :  { %1777 = vmatprep.subr.bf16.mxu1 %v2584_v29  ;;  %v2695_v29 = vld [vmem:[#allocation6 + $0x614] ss:$40 sps:$4 sm:$0xff]  }
  0xc8   :  { %1712 = vmatpush1.bf16.msra.mxu0 %v2579_v30  ;;  %v2660_v30 = vld [vmem:[#allocation6 + $0x110] ss:$40 sps:$4 sm:$0xff]  }
  0xc9   :  { %1778 = vmatpush1.bf16.msra.mxu1 %v2582_v31  ;;  %1713 = vmatprep.subr.bf16.mxu0 %v2587_v32  ;;  %v2693_v31 = vld [vmem:[#allocation6 + $0x610] ss:$40 sps:$4 sm:$0xff]   ;;  %v2665_v32 = vld [vmem:[#allocation6 + $0x164] ss:$40 sps:$4 sm:$0xff]  }
  0xca   :  { %1779 = vmatprep.subr.bf16.mxu1 %v2590_v33  ;;  %v2701_v33 = vld [vmem:[#allocation6 + $0x664] ss:$40 sps:$4 sm:$0xff]  }
  0xcc   :  { %1714 = vmatpush1.bf16.msra.mxu0 %v2585_v34  ;;  %v2668_v34 = vld [vmem:[#allocation6 + $0x1b4] ss:$40 sps:$4 sm:$0xff]  }
  0xcd   :  { %1780 = vmatpush1.bf16.msra.mxu1 %v2588_v35  ;;  %1715 = vmatprep.subr.bf16.mxu0 %v2593_v36  ;;  %v2707_v35 = vld [vmem:[#allocation6 + $0x6b4] ss:$40 sps:$4 sm:$0xff]   ;;  %v2666_v36 = vld [vmem:[#allocation6 + $0x1b0] ss:$40 sps:$4 sm:$0xff]  }
  0xce   :  { %1781 = vmatprep.subr.bf16.mxu1 %v2596_v37  ;;  %v2705_v37 = vld [vmem:[#allocation6 + $0x6b0] ss:$40 sps:$4 sm:$0xff]  }
  0xd0   :  { %1716 = vmatpush1.bf16.msra.mxu0 %v2591_v39  ;;  %v2671_v39 = vld [vmem:[#allocation6 + $0x204] ss:$40 sps:$4 sm:$0xff]  }
  0xd1   :  { %1782 = vmatpush1.bf16.msra.mxu1 %v2594_v40  ;;  %1717 = vmatprep.subr.bf16.mxu0 %v2599_v41  ;;  %v2713_v40 = vld [vmem:[#allocation6 + $0x704] ss:$40 sps:$4 sm:$0xff]   ;;  %v2669_v41 = vld [vmem:[#allocation6 + $0x200] ss:$40 sps:$4 sm:$0xff]  }
  0xd2   :  { %1783 = vmatprep.subr.bf16.mxu1 %v2602_v42  ;;  %v2711_v42 = vld [vmem:[#allocation6 + $0x700] ss:$40 sps:$4 sm:$0xff]  }
  0xd4   :  { %1718 = vmatpush1.bf16.msra.mxu0 %v2597_v43  ;;  %v2674_v43 = vld [vmem:[#allocation6 + $0x254] ss:$40 sps:$4 sm:$0xff]  }
  0xd5   :  { %1784 = vmatpush1.bf16.msra.mxu1 %v2600_v44  ;;  %1810 = vmatprep.subr.bf16.mxu0 %v2608_v46  ;;  %v2719_v44 = vld [vmem:[#allocation6 + $0x754] ss:$40 sps:$4 sm:$0xff]   ;;  %v2717_v46 = vld [vmem:[#allocation6 + $0x750] ss:$40 sps:$4 sm:$0xff]  }
  0xd6   :  { %1785 = vmatprep.subr.bf16.mxu1 %v2605_v45  ;;  %v2672_v45 = vld [vmem:[#allocation6 + $0x250] ss:$40 sps:$4 sm:$0xff]  }
  0xd7   :  { %1720 = vmatmul.mubr.bf16.vlgmr.msra.gmra.mrb[8].mxu0 %v2928_v9 }
  0xd8   :  { %1811 = vmatpush1.bf16.msra.mxu0 %v2606_v48  ;;  %1842 = vmatprep.mubr.bf16.mxu0 %v2862_v0  ;;  %v2678_v48 = vld [vmem:[#allocation6 + $0x2a0] ss:$40 sps:$4 sm:$0xff]  }
  0xd9   :  { %1786 = vmatpush1.bf16.msra.mxu1 %v2603_v47  ;;  %1812 = vmatprep.subr.bf16.mxu0 %v2614_v50  ;;  %v2680_v47 = vld [vmem:[#allocation6 + $0x2a4] ss:$40 sps:$4 sm:$0xff]   ;;  %v2684_v50 = vld [vmem:[#allocation6 + $0x2f0] ss:$40 sps:$4 sm:$0xff]  }
  0xda   :  { %1787 = vmatprep.subr.bf16.mxu1 %v2611_v49  ;;  %v2686_v49 = vld [vmem:[#allocation6 + $0x2f4] ss:$40 sps:$4 sm:$0xff]  }
  0xdc   :  { %1813 = vmatpush1.bf16.msra.mxu0 %v2612_v52  ;;  %v2690_v52 = vld [vmem:[#allocation6 + $0x340] ss:$40 sps:$4 sm:$0xff]  }
  0xdd   :  { %1788 = vmatpush1.bf16.msra.mxu1 %v2609_v51  ;;  %1814 = vmatprep.subr.bf16.mxu0 %v2620_v55  ;;  %v2692_v51 = vld [vmem:[#allocation6 + $0x344] ss:$40 sps:$4 sm:$0xff]   ;;  %v2696_v55 = vld [vmem:[#allocation6 + $0x390] ss:$40 sps:$4 sm:$0xff]  }
  0xde   :  { %1789 = vmatprep.subr.bf16.mxu1 %v2617_v54  ;;  %v2698_v54 = vld [vmem:[#allocation6 + $0x394] ss:$40 sps:$4 sm:$0xff]  }
  0xe0   :  { %1815 = vmatpush1.bf16.msra.mxu0 %v2618_v57  ;;  %v2702_v57 = vld [vmem:[#allocation6 + $0x3e0] ss:$40 sps:$4 sm:$0xff]  }
  0xe1   :  { %1790 = vmatpush1.bf16.msra.mxu1 %v2615_v56  ;;  %1816 = vmatprep.subr.bf16.mxu0 %v2626_v59  ;;  %v2704_v56 = vld [vmem:[#allocation6 + $0x3e4] ss:$40 sps:$4 sm:$0xff]   ;;  %v2708_v59 = vld [vmem:[#allocation6 + $0x430] ss:$40 sps:$4 sm:$0xff]  }
  0xe2   :  { %1791 = vmatprep.subr.bf16.mxu1 %v2623_v58  ;;  %v2710_v58 = vld [vmem:[#allocation6 + $0x434] ss:$40 sps:$4 sm:$0xff]  }
  0xe4   :  { %1817 = vmatpush1.bf16.msra.mxu0 %v2624_v61 }
  0xe5   :  { %1792 = vmatpush1.bf16.msra.mxu1 %v2621_v60  ;;  %1818 = vmatprep.subr.bf16.mxu0 %v2632_v63 }
  0xe6   :  { %1793 = vmatprep.subr.bf16.mxu1 %v2629_v62  ;;  %v2714_v62 = vld [vmem:[#allocation6 + $0x480] ss:$40 sps:$4 sm:$0xff]  }
  0xe8   :  { %1819 = vmatpush1.bf16.msra.mxu0 %v2630_v2 }
  0xe9   :  { %1794 = vmatpush1.bf16.msra.mxu1 %v2627_v1  ;;  %1820 = vmatprep.subr.bf16.mxu0 %v2638_v4  ;;  %v2722_v1 = vld [vmem:[#allocation6 + $0x4d4] ss:$40 sps:$4 sm:$0xff]   ;;  %v1970_v4 = vlaneseq }
  0xea   :  { %1795 = vmatprep.subr.bf16.mxu1 %v2635_v3  ;;  %v2720_v3 = vld [vmem:[#allocation6 + $0x4d0] ss:$40 sps:$4 sm:$0xff]  }
  0xec   :  { %1821 = vmatpush1.bf16.msra.mxu0 %v2636_v6 }
  0xed   :  { %1796 = vmatpush1.bf16.msra.mxu1 %v2633_v5  ;;  %1822 = vmatprep.subr.bf16.mxu0 %v2644_v8  ;;  %v2946_v5 = vshrl.u32 %v1970_v4, 7 }
  0xee   :  { %1797 = vmatprep.subr.bf16.mxu1 %v2641_v7  ;;  %v2949_v7 = vld [vmem:[#allocation8] sm:$0xff] }
  0xef   :  { %v1972_v6 = vsub.s32 0, %v2946_v5  ;;  %v1976_v8 = vsub.s32 1, %v2946_v5 }
  0xf0   :  { %1823 = vmatpush1.bf16.msra.mxu0 %v2642_v11 }
  0xf1   :  { %1798 = vmatpush1.bf16.msra.mxu1 %v2639_v10  ;;  %1824 = vmatprep.subr.bf16.mxu0 %v2650_v13  ;;  %v1973_v10 = vrot.slane %v2949_v7, %v1972_v6 }
  0xf2   :  { %1799 = vmatprep.subr.bf16.mxu1 %v2647_v12  ;;  %v1977_v12 = vrot.slane %v2949_v7, %v1976_v8 }
  0xf4   :  { %1825 = vmatpush1.bf16.msra.mxu0 %v2648_v15 }
  0xf5   :  { %1800 = vmatpush1.bf16.msra.mxu1 %v2645_v14  ;;  %1851 = vmatprep.subr.bf16.mxu0 %v2653_v16 }
  0xf6   :  { %1892 = vmatprep.subr.bf16.mxu1 %v2677_v17 }
  0xf7   :  { %1843 = vmatmul.mubr.bf16.vlgmr.msra.gmra.mrb[12].mxu0 %v2921_v38 }
  0xf8   :  { %1802 = vmatmul.mubr.bf16.vlgmr.msra.gmra.mrb[12].mxu1 %v2928_v9  ;;  %1852 = vmatpush1.bf16.msra.mxu0 %v2651_v18 }
  0xf9   :  { %1893 = vmatpush1.bf16.msra.mxu1 %v2675_v19  ;;  %1853 = vmatprep.subr.bf16.mxu0 %v2656_v20 }
  0xfa   :  { %1894 = vmatprep.subr.bf16.mxu1 %v2683_v21  ;;  %1924 = vmatprep.mubr.bf16.mxu1 %v2862_v0  ;;  %v2663_v0 = vld [vmem:[#allocation6 + $0x160] ss:$40 sps:$4 sm:$0xff]  }
  0xfb   :  { %1883 = vmatprep.mubr.bf16.mxu0 %v2924_v53  ;;  %v2699_v53 = vld [vmem:[#allocation6 + $0x660] ss:$40 sps:$4 sm:$0xff]  }
  0xfc   :  { %1854 = vmatpush1.bf16.msra.mxu0 %v2654_v22 }
  0xfd   :  { %1895 = vmatpush1.bf16.msra.mxu1 %v2681_v23  ;;  %1855 = vmatprep.subr.bf16.mxu0 %v2659_v24 }
  0xfe   :  { %1896 = vmatprep.subr.bf16.mxu1 %v2689_v25 }
 0x100   :  { %1856 = vmatpush1.bf16.msra.mxu0 %v2657_v26 }
 0x101   :  { %1897 = vmatpush1.bf16.msra.mxu1 %v2687_v27  ;;  %1857 = vmatprep.subr.bf16.mxu0 %v2662_v28  ;;  %v1980_v27 = vsub.s32 2, %v2946_v5  ;;  %v1984_v28 = vsub.s32 3, %v2946_v5 }
 0x102   :  { %1898 = vmatprep.subr.bf16.mxu1 %v2695_v29 }
 0x103   :  { %v1981_v29 = vrot.slane %v2949_v7, %v1980_v27 }
 0x104   :  { %1858 = vmatpush1.bf16.msra.mxu0 %v2660_v30 }
 0x105   :  { %1899 = vmatpush1.bf16.msra.mxu1 %v2693_v31  ;;  %1859 = vmatprep.subr.bf16.mxu0 %v2665_v32 }
 0x106   :  { %1900 = vmatprep.subr.bf16.mxu1 %v2701_v33  ;;  %v1985_v33 = vrot.slane %v2949_v7, %v1984_v28 }
 0x108   :  { %1860 = vmatpush1.bf16.msra.mxu0 %v2663_v0 }
 0x109   :  { %1901 = vmatpush1.bf16.msra.mxu1 %v2699_v53  ;;  %1861 = vmatprep.subr.bf16.mxu0 %v2668_v34 }
 0x10a   :  { %1902 = vmatprep.subr.bf16.mxu1 %v2707_v35 }
 0x10c   :  { %1862 = vmatpush1.bf16.msra.mxu0 %v2666_v36 }
 0x10d   :  { %1903 = vmatpush1.bf16.msra.mxu1 %v2705_v37  ;;  %1863 = vmatprep.subr.bf16.mxu0 %v2671_v39 }
 0x10e   :  { %1904 = vmatprep.subr.bf16.mxu1 %v2713_v40 }
 0x110   :  { %1864 = vmatpush1.bf16.msra.mxu0 %v2669_v41 }
 0x111   :  { %1905 = vmatpush1.bf16.msra.mxu1 %v2711_v42  ;;  %1865 = vmatprep.subr.bf16.mxu0 %v2674_v43 }
 0x112   :  { %1906 = vmatprep.subr.bf16.mxu1 %v2719_v44 }
 0x114   :  { %1866 = vmatpush1.bf16.msra.mxu0 %v2672_v45 }
 0x115   :  { %1907 = vmatpush1.bf16.msra.mxu1 %v2717_v46  ;;  %1867 = vmatprep.subr.bf16.mxu0 %v2680_v47 }
 0x118   :  { %1925 = vmatmul.mubr.bf16.vlgmr.msra.gmra.mrb[16].mxu1 %v2921_v38  ;;  %1868 = vmatpush1.bf16.msra.mxu0 %v2678_v48  ;;  %v2716_v38 = vld [vmem:[#allocation6 + $0x484] ss:$40 sps:$4 sm:$0xff]  }
 0x119   :  { %1869 = vmatprep.subr.bf16.mxu0 %v2686_v49 }
 0x11c   :  { %1870 = vmatpush1.bf16.msra.mxu0 %v2684_v50 }
 0x11d   :  { %1871 = vmatprep.subr.bf16.mxu0 %v2692_v51 }
 0x120   :  { %1872 = vmatpush1.bf16.msra.mxu0 %v2690_v52 }
 0x121   :  { %1873 = vmatprep.subr.bf16.mxu0 %v2698_v54 }
 0x124   :  { %1874 = vmatpush1.bf16.msra.mxu0 %v2696_v55 }
 0x125   :  { %1875 = vmatprep.subr.bf16.mxu0 %v2704_v56 }
 0x128   :  { %1876 = vmatpush1.bf16.msra.mxu0 %v2702_v57 }
 0x129   :  { %1877 = vmatprep.subr.bf16.mxu0 %v2710_v58 }
 0x12b   :  { %v1598_v60 = vpop.f32.mrb[0].mxu1 }
 0x12c   :  { %v1600_v61 = vpop.f32.mrb[1].mxu1  ;;  %1878 = vmatpush1.bf16.msra.mxu0 %v2708_v59 }
 0x12d   :  { %v1602_v63 = vpop.f32.mrb[2].mxu1  ;;  %1879 = vmatprep.subr.bf16.mxu0 %v2716_v38 }
 0x12e   :  { %v1603_v2 = vpop.f32.mrb[3].mxu1  ;;  %v1992_v63 = vsub.s32 5, %v2946_v5 }
 0x130   :  { %1880 = vmatpush1.bf16.msra.mxu0 %v2714_v62  ;;  %v1988_v62 = vsub.s32 4, %v2946_v5 }
 0x131   :  { %1881 = vmatprep.subr.bf16.mxu0 %v2722_v1 }
 0x132   :  { %v1989_v1 = vrot.slane %v2949_v7, %v1988_v62 }
 0x134   :  { %1882 = vmatpush1.bf16.msra.mxu0 %v2720_v3  ;;  %v1993_v3 = vrot.slane %v2949_v7, %v1992_v63 }
 0x137   :  { %1884 = vmatmul.mubr.bf16.vlgmr.msra.gmra.mrb[16].mxu0 %v2928_v9 }
 0x14a   :  { %v1557_v11 = vpop.f32.mrb[0].mxu0 }
 0x14b   :  { %v1599_v13 = vadd.f32 %v1598_v60, %v1557_v11  ;;  %v1559_v9 = vpop.f32.mrb[1].mxu0 }
 0x14c   :  { %v1601_v14 = vadd.f32 %v1600_v61, %v1559_v9  ;;  %v1561_v15 = vpop.f32.mrb[2].mxu0 }
 0x14d   :  { %v2020_v16 = vadd.f32 %v1973_v10, %v1599_v13  ;;  %v1562_v17 = vpop.f32.mrb[3].mxu0 }
 0x14e   :  { %v2021_v18 = vadd.f32 %v1977_v12, %v1601_v14 }
 0x14f   :  { %v2030_v19 = vsub.f32 0.0, %v2020_v16 }
 0x150   :  { %v2031_v20 = vsub.f32 0.0, %v2021_v18 }
 0x151   :  { %v2040_v21 = vmul.f32 1.442695, %v2030_v19 }
 0x152   :  { %v2042_v22 = vmul.f32 1.442695, %v2031_v20 }
 0x153   :  { %2723 = vpow2.f32 %v2040_v21 }
 0x154   :  { %2725 = vpow2.f32 %v2042_v22 }
 0x15d   :  { %v2724_v23 = vpop.eup %2723 }
 0x15e   :  { %v2726_v24 = vpop.eup %2725  ;;  %v2060_v25 = vadd.f32 1.0, %v2724_v23  ;;  %v1996_v23 = vsub.s32 6, %v2946_v5 }
 0x15f   :  { %v2061_v26 = vadd.f32 1.0, %v2726_v24  ;;  %v2000_v24 = vsub.s32 7, %v2946_v5 }
 0x160   :  { %2727 = vrcp.f32 %v2060_v25  ;;  %v1997_v25 = vrot.slane %v2949_v7, %v1996_v23 }
 0x161   :  { %2729 = vrcp.f32 %v2061_v26 }
 0x16a   :  { %v2728_v30 = vpop.eup %2727  ;;  %v1680_v32 = vpop.f32.mrb[4].mxu0 }
 0x16b   :  { %v1639_v31 = vpop.f32.mrb[4].mxu1  ;;  %v2730_v0 = vpop.eup %2729  ;;  %v2080_v53 = vmul.f32 %v2728_v30, %v2020_v16 }
 0x16c   :  { %v1681_v34 = vadd.f32 %v1680_v32, %v1639_v31  ;;  %v1641_v35 = vpop.f32.mrb[5].mxu1  ;;  %v1682_v36 = vpop.f32.mrb[5].mxu0  ;;  %v2081_v37 = vmul.f32 %v2730_v0, %v2021_v18 }
 0x16d   :  { %v1683_v39 = vadd.f32 %v1682_v36, %v1641_v35  ;;  %v1684_v40 = vpop.f32.mrb[6].mxu0  ;;  %v1643_v41 = vpop.f32.mrb[6].mxu1  ;;  %2090 = vst [vmem:[#allocation9] sm:$0xff] %v2080_v53 }
 0x16e   :  { %v2022_v42 = vadd.f32 %v1981_v29, %v1681_v34  ;;  %v1685_v43 = vpop.f32.mrb[7].mxu0  ;;  %v1644_v44 = vpop.f32.mrb[7].mxu1  ;;  %2091 = vst [vmem:[#allocation9 + $0x8] sm:$0xff] %v2081_v37  ;;  %v2001_v29 = vrot.slane %v2949_v7, %v2000_v24 }
 0x16f   :  { %v2023_v45 = vadd.f32 %v1985_v33, %v1683_v39 }
 0x170   :  { %v2032_v46 = vsub.f32 0.0, %v2022_v42 }
 0x171   :  { %v2033_v47 = vsub.f32 0.0, %v2023_v45 }
 0x172   :  { %v2044_v48 = vmul.f32 1.442695, %v2032_v46 }
 0x173   :  { %v2046_v49 = vmul.f32 1.442695, %v2033_v47 }
 0x174   :  { %2731 = vpow2.f32 %v2044_v48 }
 0x175   :  { %2733 = vpow2.f32 %v2046_v49 }
 0x17e   :  { %v2732_v50 = vpop.eup %2731 }
 0x17f   :  { %v2734_v51 = vpop.eup %2733  ;;  %v2062_v52 = vadd.f32 1.0, %v2732_v50 }
 0x180   :  { %v2063_v54 = vadd.f32 1.0, %v2734_v51 }
 0x181   :  { %2735 = vrcp.f32 %v2062_v52 }
 0x182   :  { %2737 = vrcp.f32 %v2063_v54 }
 0x18b   :  { %v2736_v55 = vpop.eup %2735  ;;  %v1762_v56 = vpop.f32.mrb[8].mxu1 }
 0x18c   :  { %v2738_v57 = vpop.eup %2737  ;;  %v2082_v58 = vmul.f32 %v2736_v55, %v2022_v42  ;;  %v1764_v59 = vpop.f32.mrb[9].mxu1 }
 0x18d   :  { %v2083_v38 = vmul.f32 %v2738_v57, %v2023_v45  ;;  %v1766_v60 = vpop.f32.mrb[10].mxu1 }
 0x18e   :  { %2092 = vst [vmem:[#allocation9 + $0x10] sm:$0xff] %v2082_v58  ;;  %v1767_v61 = vpop.f32.mrb[11].mxu1  ;;  %v1967_v58 = vld [vmem:[#allocation8 + $0x8] sm:$0x3] }
 0x18f   :  { %2093 = vst [vmem:[#allocation9 + $0x18] sm:$0xff] %v2083_v38  ;;  %v2009_v60 = vrot.slane %v1967_v58, %v1976_v8 }
 0x1aa   :  { %v1721_v2 = vpop.f32.mrb[8].mxu0 }
 0x1ab   :  { %v1763_v4 = vadd.f32 %v1762_v56, %v1721_v2  ;;  %v1723_v10 = vpop.f32.mrb[9].mxu0 }
 0x1ac   :  { %v1765_v11 = vadd.f32 %v1764_v59, %v1723_v10  ;;  %v1725_v12 = vpop.f32.mrb[10].mxu0  ;;  %v2005_v59 = vrot.slane %v1967_v58, %v1972_v6 }
 0x1ad   :  { %v2024_v13 = vadd.f32 %v1989_v1, %v1763_v4  ;;  %v1726_v9 = vpop.f32.mrb[11].mxu0 }
 0x1ae   :  { %v2025_v14 = vadd.f32 %v1993_v3, %v1765_v11 }
 0x1af   :  { %v2034_v15 = vsub.f32 0.0, %v2024_v13 }
 0x1b0   :  { %v2035_v16 = vsub.f32 0.0, %v2025_v14 }
 0x1b1   :  { %v2048_v17 = vmul.f32 1.442695, %v2034_v15 }
 0x1b2   :  { %v2050_v18 = vmul.f32 1.442695, %v2035_v16 }
 0x1b3   :  { %2739 = vpow2.f32 %v2048_v17 }
 0x1b4   :  { %2741 = vpow2.f32 %v2050_v18 }
 0x1bd   :  { %v2740_v19 = vpop.eup %2739 }
 0x1be   :  { %v2742_v20 = vpop.eup %2741  ;;  %v2064_v21 = vadd.f32 1.0, %v2740_v19 }
 0x1bf   :  { %v2065_v22 = vadd.f32 1.0, %v2742_v20 }
 0x1c0   :  { %2743 = vrcp.f32 %v2064_v21 }
 0x1c1   :  { %2745 = vrcp.f32 %v2065_v22 }
 0x1ca   :  { %v2744_v26 = vpop.eup %2743  ;;  %v1844_v28 = vpop.f32.mrb[12].mxu0 }
 0x1cb   :  { %v1803_v27 = vpop.f32.mrb[12].mxu1  ;;  %v2746_v30 = vpop.eup %2745  ;;  %v2084_v31 = vmul.f32 %v2744_v26, %v2024_v13 }
 0x1cc   :  { %v1845_v32 = vadd.f32 %v1844_v28, %v1803_v27  ;;  %v1805_v33 = vpop.f32.mrb[13].mxu1  ;;  %v1846_v0 = vpop.f32.mrb[13].mxu0  ;;  %v2085_v53 = vmul.f32 %v2746_v30, %v2025_v14 }
 0x1cd   :  { %v1847_v34 = vadd.f32 %v1846_v0, %v1805_v33  ;;  %v1848_v35 = vpop.f32.mrb[14].mxu0  ;;  %v1807_v36 = vpop.f32.mrb[14].mxu1  ;;  %2094 = vst [vmem:[#allocation9 + $0x20] sm:$0xff] %v2084_v31 }
 0x1ce   :  { %v2026_v37 = vadd.f32 %v1997_v25, %v1845_v32  ;;  %v1849_v39 = vpop.f32.mrb[15].mxu0  ;;  %v1808_v40 = vpop.f32.mrb[15].mxu1  ;;  %2095 = vst [vmem:[#allocation9 + $0x28] sm:$0xff] %v2085_v53 }
 0x1cf   :  { %v2027_v41 = vadd.f32 %v2001_v29, %v1847_v34 }
 0x1d0   :  { %v2036_v42 = vsub.f32 0.0, %v2026_v37 }
 0x1d1   :  { %v2037_v43 = vsub.f32 0.0, %v2027_v41 }
 0x1d2   :  { %v2052_v44 = vmul.f32 1.442695, %v2036_v42 }
 0x1d3   :  { %v2054_v45 = vmul.f32 1.442695, %v2037_v43 }
 0x1d4   :  { %2747 = vpow2.f32 %v2052_v44 }
 0x1d5   :  { %2749 = vpow2.f32 %v2054_v45 }
 0x1de   :  { %v2748_v7 = vpop.eup %2747 }
 0x1df   :  { %v2750_v46 = vpop.eup %2749  ;;  %v2066_v47 = vadd.f32 1.0, %v2748_v7 }
 0x1e0   :  { %v2067_v48 = vadd.f32 1.0, %v2750_v46 }
 0x1e1   :  { %2751 = vrcp.f32 %v2066_v47 }
 0x1e2   :  { %2753 = vrcp.f32 %v2067_v48 }
 0x1eb   :  { %v2752_v49 = vpop.eup %2751  ;;  %v1926_v50 = vpop.f32.mrb[16].mxu1 }
 0x1ec   :  { %v2754_v51 = vpop.eup %2753  ;;  %v2086_v52 = vmul.f32 %v2752_v49, %v2026_v37  ;;  %v1928_v54 = vpop.f32.mrb[17].mxu1 }
 0x1ed   :  { %v2087_v55 = vmul.f32 %v2754_v51, %v2027_v41  ;;  %v1930_v56 = vpop.f32.mrb[18].mxu1 }
 0x1ee   :  { %2096 = vst [vmem:[#allocation9 + $0x30] sm:$0xff] %v2086_v52  ;;  %v1931_v57 = vpop.f32.mrb[19].mxu1 }
 0x1ef   :  { %2097 = vst [vmem:[#allocation9 + $0x38] sm:$0xff] %v2087_v55 }
 0x20a   :  { %v1885_v38 = vpop.f32.mrb[16].mxu0 }
 0x20b   :  { %v1927_v61 = vadd.f32 %v1926_v50, %v1885_v38  ;;  %v1887_v62 = vpop.f32.mrb[17].mxu0 }
 0x20c   :  { %v1929_v63 = vadd.f32 %v1928_v54, %v1887_v62  ;;  %v1889_v1 = vpop.f32.mrb[18].mxu0 }
 0x20d   :  { %v2028_v2 = vadd.f32 %v2005_v59, %v1927_v61  ;;  %v1890_v3 = vpop.f32.mrb[19].mxu0 }
 0x20e   :  { %v2029_v4 = vadd.f32 %v2009_v60, %v1929_v63 }
 0x20f   :  { %v2038_v10 = vsub.f32 0.0, %v2028_v2 }
 0x210   :  { %v2039_v11 = vsub.f32 0.0, %v2029_v4 }
 0x211   :  { %v2056_v12 = vmul.f32 1.442695, %v2038_v10 }
 0x212   :  { %v2058_v13 = vmul.f32 1.442695, %v2039_v11 }
 0x213   :  { %2755 = vpow2.f32 %v2056_v12 }
 0x214   :  { %2757 = vpow2.f32 %v2058_v13 }
 0x21d   :  { %v2756_v9 = vpop.eup %2755 }
 0x21e   :  { %v2758_v14 = vpop.eup %2757  ;;  %v2068_v6 = vadd.f32 1.0, %v2756_v9 }
 0x21f   :  { %v2069_v15 = vadd.f32 1.0, %v2758_v14 }
 0x220   :  { %2759 = vrcp.f32 %v2068_v6 }
 0x221   :  { %2761 = vrcp.f32 %v2069_v15 }
 0x22a   :  { %v2760_v5 = vpop.eup %2759 }
 0x22b   :  { %v2762_v8 = vpop.eup %2761  ;;  %v2088_v16 = vmul.f32 %v2760_v5, %v2028_v2 }
 0x22c   :  { %v2089_v17 = vmul.f32 %v2762_v8, %v2029_v4 }
 0x22d   :  { %2098 = vst [vmem:[#allocation9 + $0x40] sm:$0xff] %v2088_v16 }
 0x22e   :  { %2099 = vst [vmem:[#allocation9 + $0x48] sm:$0xff] %v2089_v17 }
 0x22f   :  { %2840 = shalt.err (!%p2837_p0)
}
 0x230   :  { %s2841_s25 = scalar_lea.hbm %s2989_s3, 1280 }
 0x231   :  { %p2842_p1 = scmp.ne.s32.totalorder %s2989_s3, %s2841_s25  ;;  %p2845_p2 = scmp.lt.u32.totalorder %s2841_s25, %s2989_s3 }
 0x233   :  { %p2847_p3 = pnand %p2845_p2, %p2842_p1 }
 0x235   :  { %2850 = shalt.err (!%p2847_p3)
}
 0x236   :  { %2109 = dma.vmem_to_hbm [thread:$0]  %s2107_s21, 1280, %s2989_s3, [#allocation5]  }
 0x237   :  { %2855 = dma.done.wait [#allocation5], 1280  }
 0x238   :  { %2856 = vsyncadd [#allocation5], 4294966016 }
 0x239   :  { %2113 = vsyncpa [#allocation4], 1 }
 0x23a   :  { %2114 = vsyncpa [#allocation7], 1 }
 0x23b   :  { %2115 = vsyncpa [#allocation5], 1 }

</bundles_post_ra>
